<compile_context>
chip_gen: v5e
topology: v5e:2x2
jax: 0.10.0
libtpu: 0.0.40
codegen_flags: <defaults>
</compile_context>

<pallas_src>
import jax
import jax.numpy as jnp
from jax.experimental import pallas as pl
from jax.experimental.pallas import tpu as pltpu


IN_H = IN_W = 16
NUM_CLASSES = 2
LANE = 128


def _relu6(v):
    return jnp.minimum(jnp.maximum(v, 0.0), 6.0)


# ----------------------------------------------------------------------------
# Fused forward kernel (one batch element per grid step)
# ----------------------------------------------------------------------------
def _mobilenetv2_kernel(
    ph_ref,                      # (1, 4, 9, 9, 3) f32  2x2 phase-split padded input
    w1_ref, b1_ref,              # (9, 3, 32) bf16, (1, 32) f32
    wdw1_ref, bdw1_ref,          # (9, 32) f32, (1, 32) f32
    wpw1_ref, bpw1_ref,          # (32, 16) bf16, (1, 16) f32
    wexp_ref, bexp_ref,          # (16, 32) bf16, (1, 32) f32
    wdw2_ref, bdw2_ref,          # (9, 32) f32, (1, 32) f32
    wpw2_ref, bpw2_ref,          # (32, 24) bf16, (1, 24) f32
    w2_ref, b2_ref,              # (9, 24, 128) bf16, (1, 128) f32
    wfc_ref, bfc_ref,            # (128, 128) bf16, (1, 128) f32
    out_ref,                     # (1, 1, 128) f32
    pad1_ref,                    # VMEM scratch (10, 10, 32) f32
):
    f32, bf16 = jnp.float32, jnp.bfloat16

    # --- ConvBlock(3, 32, stride=2) + BN + ReLU6 ------------------------------
    # 9 accumulating MXU matmuls over contiguous phase slabs (stride handled by
    # the outside 2x2 phase split).  Output 8x8x32 kept flat as (64, 32).
    acc = jnp.zeros((64, 32), f32)
    for ky in range(3):
        for kx in range(3):
            phase = (ky % 2) * 2 + (kx % 2)
            slab = ph_ref[0, phase, ky // 2:ky // 2 + 8, kx // 2:kx // 2 + 8, :]
            acc = acc + jnp.dot(slab.reshape(64, 3).astype(bf16),
                                w1_ref[ky * 3 + kx],
                                preferred_element_type=f32)
    act = _relu6(acc + b1_ref[...])                                  # (64, 32)

    # --- IR1: depthwise 3x3 s=1 pad=1 + BN + ReLU6 ----------------------------
    # Padded activation lives in a VMEM scratch; 9 taps unrolled as VPU FMAs.
    pad1_ref[...] = jnp.zeros(pad1_ref.shape, f32)
    pad1_ref[1:9, 1:9, :] = act.reshape(8, 8, 32)
    wdw1 = wdw1_ref[...]
    dacc = jnp.zeros((8, 8, 32), f32)
    for t in range(9):
        ky, kx = t // 3, t % 3
        dacc = dacc + pad1_ref[ky:ky + 8, kx:kx + 8, :] * wdw1[t:t + 1, :]
    act = _relu6(dacc + bdw1_ref[...]).reshape(64, 32)

    # --- IR1: project 1x1 (32 -> 16) + BN (no activation, no residual) --------
    act = jnp.dot(act.astype(bf16), wpw1_ref[...],
                  preferred_element_type=f32) + bpw1_ref[...]        # (64, 16)

    # --- IR2: expand 1x1 (16 -> 32) + BN + ReLU6 ------------------------------
    act = _relu6(jnp.dot(act.astype(bf16), wexp_ref[...],
                         preferred_element_type=f32) + bexp_ref[...])  # (64, 32)

    # --- IR2: depthwise 3x3 s=3 pad=1 (8x8 -> 3x3) + BN + ReLU6 ---------------
    # Tap-unrolled; per tap, the 9 needed pixels are gathered as (1, 32) row
    # slices of the flat (64, 32) activation (zero rows for padding taps).
    wdw2 = wdw2_ref[...]
    zrow32 = jnp.zeros((1, 32), f32)
    dacc = jnp.zeros((9, 32), f32)
    for ky in range(3):
        for kx in range(3):
            pieces = []
            for oy in range(3):
                for ox in range(3):
                    r, c = 3 * oy + ky - 1, 3 * ox + kx - 1
                    if 0 <= r < 8 and 0 <= c < 8:
                        i = r * 8 + c
                        pieces.append(act[i:i + 1, :])
                    else:
                        pieces.append(zrow32)
            tap = jnp.concatenate(pieces, axis=0)                    # (9, 32)
            dacc = dacc + tap * wdw2[ky * 3 + kx:ky * 3 + kx + 1, :]
    act = _relu6(dacc + bdw2_ref[...])                               # (9, 32)

    # --- IR2: project 1x1 (32 -> 24) + BN --------------------------------------
    act = jnp.dot(act.astype(bf16), wpw2_ref[...],
                  preferred_element_type=f32) + bpw2_ref[...]        # (9, 24)

    # --- ConvBlock(24, 128, stride=2) on 3x3, pad 1 -> 2x2 + BN + ReLU6 --------
    zrow24 = jnp.zeros((1, 24), f32)
    acc = jnp.zeros((4, 128), f32)
    for ky in range(3):
        for kx in range(3):
            pieces = []
            for oy in range(2):
                for ox in range(2):
                    r, c = 2 * oy + ky - 1, 2 * ox + kx - 1
                    if 0 <= r < 3 and 0 <= c < 3:
                        i = r * 3 + c
                        pieces.append(act[i:i + 1, :])
                    else:
                        pieces.append(zrow24)
            tap = jnp.concatenate(pieces, axis=0).astype(bf16)       # (4, 24)
            acc = acc + jnp.dot(tap, w2_ref[ky * 3 + kx],
                                preferred_element_type=f32)
    y = _relu6(acc + b2_ref[...])                                    # (4, 128)

    # --- AdaptiveAvgPool2d(1) + Linear(128, 2) (padded to 128 lanes) -----------
    pooled = (y[0:1, :] + y[1:2, :] + y[2:3, :] + y[3:4, :]) * 0.25  # (1, 128)
    logits = jnp.dot(pooled.astype(bf16), wfc_ref[...],
                     preferred_element_type=f32) + bfc_ref[...]      # (1, 128)
    out_ref[0] = logits


# ----------------------------------------------------------------------------
# Parameters (deterministic synthetic init; BN folded into weights, eval mode)
# ----------------------------------------------------------------------------
def fold_bn(gamma, beta, mean, var, eps=1e-5):
    scale = gamma / jnp.sqrt(var + eps)
    bias = beta - mean * scale
    return scale, bias


def init_params(key):
    def nrm(k, shape, s):
        return s * jax.random.normal(k, shape, dtype=jnp.float32)

    def bn(k, c):
        ks = jax.random.split(k, 4)
        gamma = 1.0 + 0.1 * jax.random.normal(ks[0], (c,), jnp.float32)
        beta = 0.1 * jax.random.normal(ks[1], (c,), jnp.float32)
        mean = 0.1 * jax.random.normal(ks[2], (c,), jnp.float32)
        var = 1.0 + 0.1 * jnp.abs(jax.random.normal(ks[3], (c,), jnp.float32))
        return fold_bn(gamma, beta, mean, var)

    ks = iter(jax.random.split(key, 32))
    p = {}
    # ConvBlock(3, 32, stride=2): weight as (tap, cin, cout)
    p["c1_w"] = nrm(next(ks), (9, 3, 32), 0.2)
    p["c1_s"], p["c1_b"] = bn(next(ks), 32)
    # InvertedResidual(32, 16, t=1, stride=1)
    p["ir1_dw_w"] = nrm(next(ks), (9, 32), 0.2)
    p["ir1_dw_s"], p["ir1_dw_b"] = bn(next(ks), 32)
    p["ir1_pw_w"] = nrm(next(ks), (32, 16), 0.2)
    p["ir1_pw_s"], p["ir1_pw_b"] = bn(next(ks), 16)
    # InvertedResidual(16, 24, t=2, stride=3)
    p["ir2_exp_w"] = nrm(next(ks), (16, 32), 0.2)
    p["ir2_exp_s"], p["ir2_exp_b"] = bn(next(ks), 32)
    p["ir2_dw_w"] = nrm(next(ks), (9, 32), 0.2)
    p["ir2_dw_s"], p["ir2_dw_b"] = bn(next(ks), 32)
    p["ir2_pw_w"] = nrm(next(ks), (32, 24), 0.2)
    p["ir2_pw_s"], p["ir2_pw_b"] = bn(next(ks), 24)
    # ConvBlock(24, 128, stride=2)
    p["c2_w"] = nrm(next(ks), (9, 24, 128), 0.1)
    p["c2_s"], p["c2_b"] = bn(next(ks), 128)
    # Linear(128, 2)
    p["fc_w"] = nrm(next(ks), (128, NUM_CLASSES), 0.1)
    p["fc_b"] = nrm(next(ks), (NUM_CLASSES,), 0.1)
    return p


def prepare_params(p):
    """Fold BN scale into weights, cast MXU operands to bf16, pad fc to 128."""
    bf16, f32 = jnp.bfloat16, jnp.float32
    q = {}
    q["w1"] = (p["c1_w"] * p["c1_s"][None, None, :]).astype(bf16)
    q["b1"] = p["c1_b"].reshape(1, -1).astype(f32)
    q["wdw1"] = (p["ir1_dw_w"] * p["ir1_dw_s"][None, :]).astype(f32)
    q["bdw1"] = p["ir1_dw_b"].reshape(1, -1).astype(f32)
    q["wpw1"] = (p["ir1_pw_w"] * p["ir1_pw_s"][None, :]).astype(bf16)
    q["bpw1"] = p["ir1_pw_b"].reshape(1, -1).astype(f32)
    q["wexp"] = (p["ir2_exp_w"] * p["ir2_exp_s"][None, :]).astype(bf16)
    q["bexp"] = p["ir2_exp_b"].reshape(1, -1).astype(f32)
    q["wdw2"] = (p["ir2_dw_w"] * p["ir2_dw_s"][None, :]).astype(f32)
    q["bdw2"] = p["ir2_dw_b"].reshape(1, -1).astype(f32)
    q["wpw2"] = (p["ir2_pw_w"] * p["ir2_pw_s"][None, :]).astype(bf16)
    q["bpw2"] = p["ir2_pw_b"].reshape(1, -1).astype(f32)
    q["w2"] = (p["c2_w"] * p["c2_s"][None, None, :]).astype(bf16)
    q["b2"] = p["c2_b"].reshape(1, -1).astype(f32)
    wfc = jnp.zeros((128, LANE), f32).at[:, :NUM_CLASSES].set(p["fc_w"])
    bfc = jnp.zeros((1, LANE), f32).at[:, :NUM_CLASSES].set(
        p["fc_b"].reshape(1, -1))
    q["wfc"] = wfc.astype(bf16)
    q["bfc"] = bfc
    return q


_ARG_ORDER = ["w1", "b1", "wdw1", "bdw1", "wpw1", "bpw1", "wexp", "bexp",
              "wdw2", "bdw2", "wpw2", "bpw2", "w2", "b2", "wfc", "bfc"]


# ----------------------------------------------------------------------------
# Full forward: one fused pallas_call, grid over batch
# ----------------------------------------------------------------------------
@jax.jit
def mobilenetv2_forward(x_nchw, prepared):
    N, C, H, W = x_nchw.shape
    assert (C, H, W) == (3, IN_H, IN_W), "kernel is specialized to 3x16x16 input"
    # TODO(synk): at realistic MobileNet sizes (224x224, larger batch) the
    # per-image activations no longer fit a single VMEM block; the conv stages
    # would need an M-tiled grid with double buffering and vmem_limit_bytes.

    # NCHW -> NHWC, zero-pad by 1, split into 2x2 phases for the stride-2 conv1
    # (pure layout prep, same byte volume as the input -- no im2col blowup).
    x = jnp.transpose(x_nchw, (0, 2, 3, 1)).astype(jnp.float32)
    xp = jnp.pad(x, ((0, 0), (1, 1), (1, 1), (0, 0)))            # (N, 18, 18, 3)
    phases = jnp.stack(
        [xp[:, a::2, b::2, :] for a in range(2) for b in range(2)], axis=1
    )                                                            # (N, 4, 9, 9, 3)

    weights = [prepared[k] for k in _ARG_ORDER]
    in_specs = [pl.BlockSpec((1,) + phases.shape[1:],
                             lambda i: (i, 0, 0, 0, 0))]
    for warr in weights:
        zeros_idx = (0,) * warr.ndim
        in_specs.append(pl.BlockSpec(warr.shape, lambda i, _z=zeros_idx: _z))

    out = pl.pallas_call(
        _mobilenetv2_kernel,
        out_shape=jax.ShapeDtypeStruct((N, 1, LANE), jnp.float32),
        grid=(N,),
        in_specs=in_specs,
        out_specs=pl.BlockSpec((1, 1, LANE), lambda i: (i, 0, 0)),
        scratch_shapes=[pltpu.VMEM((10, 10, 32), jnp.float32)],
        compiler_params=pltpu.CompilerParams(
            dimension_semantics=("parallel",),
        ),
    )(phases, *weights)
    return out[:, 0, :NUM_CLASSES]


# TODO(synk): PyTorch BatchNorm in training mode uses batch statistics; here BN
# is modeled in eval mode with running stats folded into the weights/bias.

if __name__ == "__main__":
    key = jax.random.PRNGKey(0)
    pk, xk = jax.random.split(key)
    params = init_params(pk)
    prepared = prepare_params(params)
    # PyTorch-style NCHW input: batch=2, channels=3 (RGB), spatial=16x16
    x = jax.random.normal(xk, (2, 3, IN_H, IN_W), dtype=jnp.float32)

    out = mobilenetv2_forward(x, prepared)
    out = jax.block_until_ready(out)
    assert out.shape == (2, NUM_CLASSES), out.shape
    assert bool(jnp.all(jnp.isfinite(out)))
    print("KERNEL_OK")
</pallas_src>

<mosaic_0001>
module attributes {stable_mosaic.version = 11 : i64} {
  func.func @_mobilenetv2_kernel(%arg0: i32, %arg1: memref<1x4x9x9x3xf32, #tpu.memory_space<vmem>>, %arg2: memref<9x3x32xbf16, #tpu.memory_space<vmem>>, %arg3: memref<1x32xf32, #tpu.memory_space<vmem>>, %arg4: memref<9x32xf32, #tpu.memory_space<vmem>>, %arg5: memref<1x32xf32, #tpu.memory_space<vmem>>, %arg6: memref<32x16xbf16, #tpu.memory_space<vmem>>, %arg7: memref<1x16xf32, #tpu.memory_space<vmem>>, %arg8: memref<16x32xbf16, #tpu.memory_space<vmem>>, %arg9: memref<1x32xf32, #tpu.memory_space<vmem>>, %arg10: memref<9x32xf32, #tpu.memory_space<vmem>>, %arg11: memref<1x32xf32, #tpu.memory_space<vmem>>, %arg12: memref<32x24xbf16, #tpu.memory_space<vmem>>, %arg13: memref<1x24xf32, #tpu.memory_space<vmem>>, %arg14: memref<9x24x128xbf16, #tpu.memory_space<vmem>>, %arg15: memref<1x128xf32, #tpu.memory_space<vmem>>, %arg16: memref<128x128xbf16, #tpu.memory_space<vmem>>, %arg17: memref<1x128xf32, #tpu.memory_space<vmem>>, %arg18: memref<1x1x128xf32, #tpu.memory_space<vmem>>, %arg19: memref<10x10x32xf32, #tpu.memory_space<vmem>>) attributes {dimension_semantics = [#tpu.dimension_semantics<parallel>], iteration_bounds = array<i64: 2>, scalar_prefetch = 0 : i64, scratch_operands = 1 : i64, tpu.core_type = #tpu.core_type<tc>, window_params = [{transform_indices = @transform_0, window_bounds = array<i64: 1, 4, 9, 9, 3>}, {pipeline_mode = #tpu.pipeline_mode<synchronous>, transform_indices = @transform_1, window_bounds = array<i64: 9, 3, 32>}, {pipeline_mode = #tpu.pipeline_mode<synchronous>, transform_indices = @transform_2, window_bounds = array<i64: 1, 32>}, {pipeline_mode = #tpu.pipeline_mode<synchronous>, transform_indices = @transform_3, window_bounds = array<i64: 9, 32>}, {pipeline_mode = #tpu.pipeline_mode<synchronous>, transform_indices = @transform_4, window_bounds = array<i64: 1, 32>}, {pipeline_mode = #tpu.pipeline_mode<synchronous>, transform_indices = @transform_5, window_bounds = array<i64: 32, 16>}, {pipeline_mode = #tpu.pipeline_mode<synchronous>, transform_indices = @transform_6, window_bounds = array<i64: 1, 16>}, {pipeline_mode = #tpu.pipeline_mode<synchronous>, transform_indices = @transform_7, window_bounds = array<i64: 16, 32>}, {pipeline_mode = #tpu.pipeline_mode<synchronous>, transform_indices = @transform_8, window_bounds = array<i64: 1, 32>}, {pipeline_mode = #tpu.pipeline_mode<synchronous>, transform_indices = @transform_9, window_bounds = array<i64: 9, 32>}, {pipeline_mode = #tpu.pipeline_mode<synchronous>, transform_indices = @transform_10, window_bounds = array<i64: 1, 32>}, {pipeline_mode = #tpu.pipeline_mode<synchronous>, transform_indices = @transform_11, window_bounds = array<i64: 32, 24>}, {pipeline_mode = #tpu.pipeline_mode<synchronous>, transform_indices = @transform_12, window_bounds = array<i64: 1, 24>}, {pipeline_mode = #tpu.pipeline_mode<synchronous>, transform_indices = @transform_13, window_bounds = array<i64: 9, 24, 128>}, {pipeline_mode = #tpu.pipeline_mode<synchronous>, transform_indices = @transform_14, window_bounds = array<i64: 1, 128>}, {pipeline_mode = #tpu.pipeline_mode<synchronous>, transform_indices = @transform_15, window_bounds = array<i64: 128, 128>}, {pipeline_mode = #tpu.pipeline_mode<synchronous>, transform_indices = @transform_16, window_bounds = array<i64: 1, 128>}, {transform_indices = @transform_17, window_bounds = array<i64: 1, 1, 128>}]} {
    %cst = arith.constant 0.000000e+00 : f32
    %0 = vector.broadcast %cst : f32 to vector<64x32xf32>
    %c0 = arith.constant 0 : index
    %c0_0 = arith.constant 0 : index
    %c0_1 = arith.constant 0 : index
    %c0_2 = arith.constant 0 : index
    %c0_3 = arith.constant 0 : index
    %1 = vector.load %arg1[%c0, %c0_0, %c0_1, %c0_2, %c0_3] : memref<1x4x9x9x3xf32, #tpu.memory_space<vmem>>, vector<1x1x8x8x3xf32>
    %2 = vector.shape_cast %1 : vector<1x1x8x8x3xf32> to vector<8x8x3xf32>
    %3 = vector.shape_cast %2 : vector<8x8x3xf32> to vector<64x3xf32>
    %4 = arith.truncf %3 : vector<64x3xf32> to vector<64x3xbf16>
    %c0_4 = arith.constant 0 : index
    %c0_5 = arith.constant 0 : index
    %c0_6 = arith.constant 0 : index
    %5 = vector.load %arg2[%c0_4, %c0_5, %c0_6] : memref<9x3x32xbf16, #tpu.memory_space<vmem>>, vector<1x3x32xbf16>
    %6 = vector.shape_cast %5 : vector<1x3x32xbf16> to vector<3x32xbf16>
    %cst_7 = arith.constant dense<0.000000e+00> : vector<64x32xf32>
    %7 = tpu.matmul %4, %6, %cst_7 {dimension_numbers = #tpu.dot_dimension_numbers<[1], [0], [0], [1], [0, 0, 1, 1], [], []>} : vector<64x3xbf16>, vector<3x32xbf16>, vector<64x32xf32> -> vector<64x32xf32>
    %8 = arith.addf %0, %7 : vector<64x32xf32>
    %c0_8 = arith.constant 0 : index
    %c1 = arith.constant 1 : index
    %c0_9 = arith.constant 0 : index
    %c0_10 = arith.constant 0 : index
    %c0_11 = arith.constant 0 : index
    %9 = vector.load %arg1[%c0_8, %c1, %c0_9, %c0_10, %c0_11] : memref<1x4x9x9x3xf32, #tpu.memory_space<vmem>>, vector<1x1x8x8x3xf32>
    %10 = vector.shape_cast %9 : vector<1x1x8x8x3xf32> to vector<8x8x3xf32>
    %11 = vector.shape_cast %10 : vector<8x8x3xf32> to vector<64x3xf32>
    %12 = arith.truncf %11 : vector<64x3xf32> to vector<64x3xbf16>
    %c1_12 = arith.constant 1 : index
    %c0_13 = arith.constant 0 : index
    %c0_14 = arith.constant 0 : index
    %13 = vector.load %arg2[%c1_12, %c0_13, %c0_14] : memref<9x3x32xbf16, #tpu.memory_space<vmem>>, vector<1x3x32xbf16>
    %14 = vector.shape_cast %13 : vector<1x3x32xbf16> to vector<3x32xbf16>
    %cst_15 = arith.constant dense<0.000000e+00> : vector<64x32xf32>
    %15 = tpu.matmul %12, %14, %cst_15 {dimension_numbers = #tpu.dot_dimension_numbers<[1], [0], [0], [1], [0, 0, 1, 1], [], []>} : vector<64x3xbf16>, vector<3x32xbf16>, vector<64x32xf32> -> vector<64x32xf32>
    %16 = arith.addf %8, %15 : vector<64x32xf32>
    %c0_16 = arith.constant 0 : index
    %c0_17 = arith.constant 0 : index
    %c0_18 = arith.constant 0 : index
    %c1_19 = arith.constant 1 : index
    %c0_20 = arith.constant 0 : index
    %17 = vector.load %arg1[%c0_16, %c0_17, %c0_18, %c1_19, %c0_20] : memref<1x4x9x9x3xf32, #tpu.memory_space<vmem>>, vector<1x1x8x8x3xf32>
    %18 = vector.shape_cast %17 : vector<1x1x8x8x3xf32> to vector<8x8x3xf32>
    %19 = vector.shape_cast %18 : vector<8x8x3xf32> to vector<64x3xf32>
    %20 = arith.truncf %19 : vector<64x3xf32> to vector<64x3xbf16>
    %c2 = arith.constant 2 : index
    %c0_21 = arith.constant 0 : index
    %c0_22 = arith.constant 0 : index
    %21 = vector.load %arg2[%c2, %c0_21, %c0_22] : memref<9x3x32xbf16, #tpu.memory_space<vmem>>, vector<1x3x32xbf16>
    %22 = vector.shape_cast %21 : vector<1x3x32xbf16> to vector<3x32xbf16>
    %cst_23 = arith.constant dense<0.000000e+00> : vector<64x32xf32>
    %23 = tpu.matmul %20, %22, %cst_23 {dimension_numbers = #tpu.dot_dimension_numbers<[1], [0], [0], [1], [0, 0, 1, 1], [], []>} : vector<64x3xbf16>, vector<3x32xbf16>, vector<64x32xf32> -> vector<64x32xf32>
    %24 = arith.addf %16, %23 : vector<64x32xf32>
    %c0_24 = arith.constant 0 : index
    %c2_25 = arith.constant 2 : index
    %c0_26 = arith.constant 0 : index
    %c0_27 = arith.constant 0 : index
    %c0_28 = arith.constant 0 : index
    %25 = vector.load %arg1[%c0_24, %c2_25, %c0_26, %c0_27, %c0_28] : memref<1x4x9x9x3xf32, #tpu.memory_space<vmem>>, vector<1x1x8x8x3xf32>
    %26 = vector.shape_cast %25 : vector<1x1x8x8x3xf32> to vector<8x8x3xf32>
    %27 = vector.shape_cast %26 : vector<8x8x3xf32> to vector<64x3xf32>
    %28 = arith.truncf %27 : vector<64x3xf32> to vector<64x3xbf16>
    %c3 = arith.constant 3 : index
    %c0_29 = arith.constant 0 : index
    %c0_30 = arith.constant 0 : index
    %29 = vector.load %arg2[%c3, %c0_29, %c0_30] : memref<9x3x32xbf16, #tpu.memory_space<vmem>>, vector<1x3x32xbf16>
    %30 = vector.shape_cast %29 : vector<1x3x32xbf16> to vector<3x32xbf16>
    %cst_31 = arith.constant dense<0.000000e+00> : vector<64x32xf32>
    %31 = tpu.matmul %28, %30, %cst_31 {dimension_numbers = #tpu.dot_dimension_numbers<[1], [0], [0], [1], [0, 0, 1, 1], [], []>} : vector<64x3xbf16>, vector<3x32xbf16>, vector<64x32xf32> -> vector<64x32xf32>
    %32 = arith.addf %24, %31 : vector<64x32xf32>
    %c0_32 = arith.constant 0 : index
    %c3_33 = arith.constant 3 : index
    %c0_34 = arith.constant 0 : index
    %c0_35 = arith.constant 0 : index
    %c0_36 = arith.constant 0 : index
    %33 = vector.load %arg1[%c0_32, %c3_33, %c0_34, %c0_35, %c0_36] : memref<1x4x9x9x3xf32, #tpu.memory_space<vmem>>, vector<1x1x8x8x3xf32>
    %34 = vector.shape_cast %33 : vector<1x1x8x8x3xf32> to vector<8x8x3xf32>
    %35 = vector.shape_cast %34 : vector<8x8x3xf32> to vector<64x3xf32>
    %36 = arith.truncf %35 : vector<64x3xf32> to vector<64x3xbf16>
    %c4 = arith.constant 4 : index
    %c0_37 = arith.constant 0 : index
    %c0_38 = arith.constant 0 : index
    %37 = vector.load %arg2[%c4, %c0_37, %c0_38] : memref<9x3x32xbf16, #tpu.memory_space<vmem>>, vector<1x3x32xbf16>
    %38 = vector.shape_cast %37 : vector<1x3x32xbf16> to vector<3x32xbf16>
    %cst_39 = arith.constant dense<0.000000e+00> : vector<64x32xf32>
    %39 = tpu.matmul %36, %38, %cst_39 {dimension_numbers = #tpu.dot_dimension_numbers<[1], [0], [0], [1], [0, 0, 1, 1], [], []>} : vector<64x3xbf16>, vector<3x32xbf16>, vector<64x32xf32> -> vector<64x32xf32>
    %40 = arith.addf %32, %39 : vector<64x32xf32>
    %c0_40 = arith.constant 0 : index
    %c2_41 = arith.constant 2 : index
    %c0_42 = arith.constant 0 : index
    %c1_43 = arith.constant 1 : index
    %c0_44 = arith.constant 0 : index
    %41 = vector.load %arg1[%c0_40, %c2_41, %c0_42, %c1_43, %c0_44] : memref<1x4x9x9x3xf32, #tpu.memory_space<vmem>>, vector<1x1x8x8x3xf32>
    %42 = vector.shape_cast %41 : vector<1x1x8x8x3xf32> to vector<8x8x3xf32>
    %43 = vector.shape_cast %42 : vector<8x8x3xf32> to vector<64x3xf32>
    %44 = arith.truncf %43 : vector<64x3xf32> to vector<64x3xbf16>
    %c5 = arith.constant 5 : index
    %c0_45 = arith.constant 0 : index
    %c0_46 = arith.constant 0 : index
    %45 = vector.load %arg2[%c5, %c0_45, %c0_46] : memref<9x3x32xbf16, #tpu.memory_space<vmem>>, vector<1x3x32xbf16>
    %46 = vector.shape_cast %45 : vector<1x3x32xbf16> to vector<3x32xbf16>
    %cst_47 = arith.constant dense<0.000000e+00> : vector<64x32xf32>
    %47 = tpu.matmul %44, %46, %cst_47 {dimension_numbers = #tpu.dot_dimension_numbers<[1], [0], [0], [1], [0, 0, 1, 1], [], []>} : vector<64x3xbf16>, vector<3x32xbf16>, vector<64x32xf32> -> vector<64x32xf32>
    %48 = arith.addf %40, %47 : vector<64x32xf32>
    %c0_48 = arith.constant 0 : index
    %c0_49 = arith.constant 0 : index
    %c1_50 = arith.constant 1 : index
    %c0_51 = arith.constant 0 : index
    %c0_52 = arith.constant 0 : index
    %49 = vector.load %arg1[%c0_48, %c0_49, %c1_50, %c0_51, %c0_52] : memref<1x4x9x9x3xf32, #tpu.memory_space<vmem>>, vector<1x1x8x8x3xf32>
    %50 = vector.shape_cast %49 : vector<1x1x8x8x3xf32> to vector<8x8x3xf32>
    %51 = vector.shape_cast %50 : vector<8x8x3xf32> to vector<64x3xf32>
    %52 = arith.truncf %51 : vector<64x3xf32> to vector<64x3xbf16>
    %c6 = arith.constant 6 : index
    %c0_53 = arith.constant 0 : index
    %c0_54 = arith.constant 0 : index
    %53 = vector.load %arg2[%c6, %c0_53, %c0_54] : memref<9x3x32xbf16, #tpu.memory_space<vmem>>, vector<1x3x32xbf16>
    %54 = vector.shape_cast %53 : vector<1x3x32xbf16> to vector<3x32xbf16>
    %cst_55 = arith.constant dense<0.000000e+00> : vector<64x32xf32>
    %55 = tpu.matmul %52, %54, %cst_55 {dimension_numbers = #tpu.dot_dimension_numbers<[1], [0], [0], [1], [0, 0, 1, 1], [], []>} : vector<64x3xbf16>, vector<3x32xbf16>, vector<64x32xf32> -> vector<64x32xf32>
    %56 = arith.addf %48, %55 : vector<64x32xf32>
    %c0_56 = arith.constant 0 : index
    %c1_57 = arith.constant 1 : index
    %c1_58 = arith.constant 1 : index
    %c0_59 = arith.constant 0 : index
    %c0_60 = arith.constant 0 : index
    %57 = vector.load %arg1[%c0_56, %c1_57, %c1_58, %c0_59, %c0_60] : memref<1x4x9x9x3xf32, #tpu.memory_space<vmem>>, vector<1x1x8x8x3xf32>
    %58 = vector.shape_cast %57 : vector<1x1x8x8x3xf32> to vector<8x8x3xf32>
    %59 = vector.shape_cast %58 : vector<8x8x3xf32> to vector<64x3xf32>
    %60 = arith.truncf %59 : vector<64x3xf32> to vector<64x3xbf16>
    %c7 = arith.constant 7 : index
    %c0_61 = arith.constant 0 : index
    %c0_62 = arith.constant 0 : index
    %61 = vector.load %arg2[%c7, %c0_61, %c0_62] : memref<9x3x32xbf16, #tpu.memory_space<vmem>>, vector<1x3x32xbf16>
    %62 = vector.shape_cast %61 : vector<1x3x32xbf16> to vector<3x32xbf16>
    %cst_63 = arith.constant dense<0.000000e+00> : vector<64x32xf32>
    %63 = tpu.matmul %60, %62, %cst_63 {dimension_numbers = #tpu.dot_dimension_numbers<[1], [0], [0], [1], [0, 0, 1, 1], [], []>} : vector<64x3xbf16>, vector<3x32xbf16>, vector<64x32xf32> -> vector<64x32xf32>
    %64 = arith.addf %56, %63 : vector<64x32xf32>
    %c0_64 = arith.constant 0 : index
    %c0_65 = arith.constant 0 : index
    %c1_66 = arith.constant 1 : index
    %c1_67 = arith.constant 1 : index
    %c0_68 = arith.constant 0 : index
    %65 = vector.load %arg1[%c0_64, %c0_65, %c1_66, %c1_67, %c0_68] : memref<1x4x9x9x3xf32, #tpu.memory_space<vmem>>, vector<1x1x8x8x3xf32>
    %66 = vector.shape_cast %65 : vector<1x1x8x8x3xf32> to vector<8x8x3xf32>
    %67 = vector.shape_cast %66 : vector<8x8x3xf32> to vector<64x3xf32>
    %68 = arith.truncf %67 : vector<64x3xf32> to vector<64x3xbf16>
    %c8 = arith.constant 8 : index
    %c0_69 = arith.constant 0 : index
    %c0_70 = arith.constant 0 : index
    %69 = vector.load %arg2[%c8, %c0_69, %c0_70] : memref<9x3x32xbf16, #tpu.memory_space<vmem>>, vector<1x3x32xbf16>
    %70 = vector.shape_cast %69 : vector<1x3x32xbf16> to vector<3x32xbf16>
    %cst_71 = arith.constant dense<0.000000e+00> : vector<64x32xf32>
    %71 = tpu.matmul %68, %70, %cst_71 {dimension_numbers = #tpu.dot_dimension_numbers<[1], [0], [0], [1], [0, 0, 1, 1], [], []>} : vector<64x3xbf16>, vector<3x32xbf16>, vector<64x32xf32> -> vector<64x32xf32>
    %72 = arith.addf %64, %71 : vector<64x32xf32>
    %c0_72 = arith.constant 0 : index
    %c0_73 = arith.constant 0 : index
    %73 = vector.load %arg3[%c0_72, %c0_73] : memref<1x32xf32, #tpu.memory_space<vmem>>, vector<1x32xf32>
    %74 = vector.broadcast %73 : vector<1x32xf32> to vector<64x32xf32>
    %75 = arith.addf %72, %74 : vector<64x32xf32>
    %cst_74 = arith.constant 0.000000e+00 : f32
    %76 = vector.broadcast %cst_74 : f32 to vector<64x32xf32>
    %77 = arith.maximumf %75, %76 : vector<64x32xf32>
    %cst_75 = arith.constant 6.000000e+00 : f32
    %78 = vector.broadcast %cst_75 : f32 to vector<64x32xf32>
    %79 = arith.minimumf %77, %78 : vector<64x32xf32>
    %cst_76 = arith.constant 0.000000e+00 : f32
    %80 = vector.broadcast %cst_76 : f32 to vector<10x10x32xf32>
    %c0_77 = arith.constant 0 : index
    %c0_78 = arith.constant 0 : index
    %c0_79 = arith.constant 0 : index
    %81 = vector.load %arg19[%c0_77, %c0_78, %c0_79] : memref<10x10x32xf32, #tpu.memory_space<vmem>>, vector<10x10x32xf32>
    tpu.vector_store %arg19[%c0_77, %c0_78, %c0_79], %80 {strides = array<i32>} : memref<10x10x32xf32, #tpu.memory_space<vmem>>, vector<10x10x32xf32>,
    %82 = vector.shape_cast %79 : vector<64x32xf32> to vector<8x8x32xf32>
    %c1_80 = arith.constant 1 : index
    %c1_81 = arith.constant 1 : index
    %c0_82 = arith.constant 0 : index
    %83 = vector.load %arg19[%c1_80, %c1_81, %c0_82] : memref<10x10x32xf32, #tpu.memory_space<vmem>>, vector<8x8x32xf32>
    tpu.vector_store %arg19[%c1_80, %c1_81, %c0_82], %82 {strides = array<i32>} : memref<10x10x32xf32, #tpu.memory_space<vmem>>, vector<8x8x32xf32>,
    %c0_83 = arith.constant 0 : index
    %c0_84 = arith.constant 0 : index
    %84 = vector.load %arg4[%c0_83, %c0_84] : memref<9x32xf32, #tpu.memory_space<vmem>>, vector<9x32xf32>
    %cst_85 = arith.constant 0.000000e+00 : f32
    %85 = vector.broadcast %cst_85 : f32 to vector<8x8x32xf32>
    %c0_86 = arith.constant 0 : index
    %c0_87 = arith.constant 0 : index
    %c0_88 = arith.constant 0 : index
    %86 = vector.load %arg19[%c0_86, %c0_87, %c0_88] : memref<10x10x32xf32, #tpu.memory_space<vmem>>, vector<8x8x32xf32>
    %87 = vector.extract_strided_slice %84 {offsets = [0, 0], sizes = [1, 32], strides = [1, 1]} : vector<9x32xf32> to vector<1x32xf32>
    %88 = vector.shape_cast %87 : vector<1x32xf32> to vector<1x1x32xf32>
    %89 = vector.broadcast %88 : vector<1x1x32xf32> to vector<8x8x32xf32>
    %90 = arith.mulf %86, %89 : vector<8x8x32xf32>
    %91 = arith.addf %85, %90 : vector<8x8x32xf32>
    %c0_89 = arith.constant 0 : index
    %c1_90 = arith.constant 1 : index
    %c0_91 = arith.constant 0 : index
    %92 = vector.load %arg19[%c0_89, %c1_90, %c0_91] : memref<10x10x32xf32, #tpu.memory_space<vmem>>, vector<8x8x32xf32>
    %93 = vector.extract_strided_slice %84 {offsets = [1, 0], sizes = [1, 32], strides = [1, 1]} : vector<9x32xf32> to vector<1x32xf32>
    %94 = vector.shape_cast %93 : vector<1x32xf32> to vector<1x1x32xf32>
    %95 = vector.broadcast %94 : vector<1x1x32xf32> to vector<8x8x32xf32>
    %96 = arith.mulf %92, %95 : vector<8x8x32xf32>
    %97 = arith.addf %91, %96 : vector<8x8x32xf32>
    %c0_92 = arith.constant 0 : index
    %c2_93 = arith.constant 2 : index
    %c0_94 = arith.constant 0 : index
    %98 = vector.load %arg19[%c0_92, %c2_93, %c0_94] : memref<10x10x32xf32, #tpu.memory_space<vmem>>, vector<8x8x32xf32>
    %99 = vector.extract_strided_slice %84 {offsets = [2, 0], sizes = [1, 32], strides = [1, 1]} : vector<9x32xf32> to vector<1x32xf32>
    %100 = vector.shape_cast %99 : vector<1x32xf32> to vector<1x1x32xf32>
    %101 = vector.broadcast %100 : vector<1x1x32xf32> to vector<8x8x32xf32>
    %102 = arith.mulf %98, %101 : vector<8x8x32xf32>
    %103 = arith.addf %97, %102 : vector<8x8x32xf32>
    %c1_95 = arith.constant 1 : index
    %c0_96 = arith.constant 0 : index
    %c0_97 = arith.constant 0 : index
    %104 = vector.load %arg19[%c1_95, %c0_96, %c0_97] : memref<10x10x32xf32, #tpu.memory_space<vmem>>, vector<8x8x32xf32>
    %105 = vector.extract_strided_slice %84 {offsets = [3, 0], sizes = [1, 32], strides = [1, 1]} : vector<9x32xf32> to vector<1x32xf32>
    %106 = vector.shape_cast %105 : vector<1x32xf32> to vector<1x1x32xf32>
    %107 = vector.broadcast %106 : vector<1x1x32xf32> to vector<8x8x32xf32>
    %108 = arith.mulf %104, %107 : vector<8x8x32xf32>
    %109 = arith.addf %103, %108 : vector<8x8x32xf32>
    %c1_98 = arith.constant 1 : index
    %c1_99 = arith.constant 1 : index
    %c0_100 = arith.constant 0 : index
    %110 = vector.load %arg19[%c1_98, %c1_99, %c0_100] : memref<10x10x32xf32, #tpu.memory_space<vmem>>, vector<8x8x32xf32>
    %111 = vector.extract_strided_slice %84 {offsets = [4, 0], sizes = [1, 32], strides = [1, 1]} : vector<9x32xf32> to vector<1x32xf32>
    %112 = vector.shape_cast %111 : vector<1x32xf32> to vector<1x1x32xf32>
    %113 = vector.broadcast %112 : vector<1x1x32xf32> to vector<8x8x32xf32>
    %114 = arith.mulf %110, %113 : vector<8x8x32xf32>
    %115 = arith.addf %109, %114 : vector<8x8x32xf32>
    %c1_101 = arith.constant 1 : index
    %c2_102 = arith.constant 2 : index
    %c0_103 = arith.constant 0 : index
    %116 = vector.load %arg19[%c1_101, %c2_102, %c0_103] : memref<10x10x32xf32, #tpu.memory_space<vmem>>, vector<8x8x32xf32>
    %117 = vector.extract_strided_slice %84 {offsets = [5, 0], sizes = [1, 32], strides = [1, 1]} : vector<9x32xf32> to vector<1x32xf32>
    %118 = vector.shape_cast %117 : vector<1x32xf32> to vector<1x1x32xf32>
    %119 = vector.broadcast %118 : vector<1x1x32xf32> to vector<8x8x32xf32>
    %120 = arith.mulf %116, %119 : vector<8x8x32xf32>
    %121 = arith.addf %115, %120 : vector<8x8x32xf32>
    %c2_104 = arith.constant 2 : index
    %c0_105 = arith.constant 0 : index
    %c0_106 = arith.constant 0 : index
    %122 = vector.load %arg19[%c2_104, %c0_105, %c0_106] : memref<10x10x32xf32, #tpu.memory_space<vmem>>, vector<8x8x32xf32>
    %123 = vector.extract_strided_slice %84 {offsets = [6, 0], sizes = [1, 32], strides = [1, 1]} : vector<9x32xf32> to vector<1x32xf32>
    %124 = vector.shape_cast %123 : vector<1x32xf32> to vector<1x1x32xf32>
    %125 = vector.broadcast %124 : vector<1x1x32xf32> to vector<8x8x32xf32>
    %126 = arith.mulf %122, %125 : vector<8x8x32xf32>
    %127 = arith.addf %121, %126 : vector<8x8x32xf32>
    %c2_107 = arith.constant 2 : index
    %c1_108 = arith.constant 1 : index
    %c0_109 = arith.constant 0 : index
    %128 = vector.load %arg19[%c2_107, %c1_108, %c0_109] : memref<10x10x32xf32, #tpu.memory_space<vmem>>, vector<8x8x32xf32>
    %129 = vector.extract_strided_slice %84 {offsets = [7, 0], sizes = [1, 32], strides = [1, 1]} : vector<9x32xf32> to vector<1x32xf32>
    %130 = vector.shape_cast %129 : vector<1x32xf32> to vector<1x1x32xf32>
    %131 = vector.broadcast %130 : vector<1x1x32xf32> to vector<8x8x32xf32>
    %132 = arith.mulf %128, %131 : vector<8x8x32xf32>
    %133 = arith.addf %127, %132 : vector<8x8x32xf32>
    %c2_110 = arith.constant 2 : index
    %c2_111 = arith.constant 2 : index
    %c0_112 = arith.constant 0 : index
    %134 = vector.load %arg19[%c2_110, %c2_111, %c0_112] : memref<10x10x32xf32, #tpu.memory_space<vmem>>, vector<8x8x32xf32>
    %135 = vector.extract_strided_slice %84 {offsets = [8, 0], sizes = [1, 32], strides = [1, 1]} : vector<9x32xf32> to vector<1x32xf32>
    %136 = vector.shape_cast %135 : vector<1x32xf32> to vector<1x1x32xf32>
    %137 = vector.broadcast %136 : vector<1x1x32xf32> to vector<8x8x32xf32>
    %138 = arith.mulf %134, %137 : vector<8x8x32xf32>
    %139 = arith.addf %133, %138 : vector<8x8x32xf32>
    %c0_113 = arith.constant 0 : index
    %c0_114 = arith.constant 0 : index
    %140 = vector.load %arg5[%c0_113, %c0_114] : memref<1x32xf32, #tpu.memory_space<vmem>>, vector<1x32xf32>
    %141 = vector.shape_cast %140 : vector<1x32xf32> to vector<1x1x32xf32>
    %142 = vector.broadcast %141 : vector<1x1x32xf32> to vector<8x8x32xf32>
    %143 = arith.addf %139, %142 : vector<8x8x32xf32>
    %cst_115 = arith.constant 0.000000e+00 : f32
    %144 = vector.broadcast %cst_115 : f32 to vector<8x8x32xf32>
    %145 = arith.maximumf %143, %144 : vector<8x8x32xf32>
    %cst_116 = arith.constant 6.000000e+00 : f32
    %146 = vector.broadcast %cst_116 : f32 to vector<8x8x32xf32>
    %147 = arith.minimumf %145, %146 : vector<8x8x32xf32>
    %148 = vector.shape_cast %147 : vector<8x8x32xf32> to vector<64x32xf32>
    %149 = arith.truncf %148 : vector<64x32xf32> to vector<64x32xbf16>
    %c0_117 = arith.constant 0 : index
    %c0_118 = arith.constant 0 : index
    %150 = vector.load %arg6[%c0_117, %c0_118] : memref<32x16xbf16, #tpu.memory_space<vmem>>, vector<32x16xbf16>
    %cst_119 = arith.constant dense<0.000000e+00> : vector<64x16xf32>
    %151 = tpu.matmul %149, %150, %cst_119 {dimension_numbers = #tpu.dot_dimension_numbers<[1], [0], [0], [1], [0, 0, 1, 1], [], []>} : vector<64x32xbf16>, vector<32x16xbf16>, vector<64x16xf32> -> vector<64x16xf32>
    %c0_120 = arith.constant 0 : index
    %c0_121 = arith.constant 0 : index
    %152 = vector.load %arg7[%c0_120, %c0_121] : memref<1x16xf32, #tpu.memory_space<vmem>>, vector<1x16xf32>
    %153 = vector.broadcast %152 : vector<1x16xf32> to vector<64x16xf32>
    %154 = arith.addf %151, %153 : vector<64x16xf32>
    %155 = arith.truncf %154 : vector<64x16xf32> to vector<64x16xbf16>
    %c0_122 = arith.constant 0 : index
    %c0_123 = arith.constant 0 : index
    %156 = vector.load %arg8[%c0_122, %c0_123] : memref<16x32xbf16, #tpu.memory_space<vmem>>, vector<16x32xbf16>
    %cst_124 = arith.constant dense<0.000000e+00> : vector<64x32xf32>
    %157 = tpu.matmul %155, %156, %cst_124 {dimension_numbers = #tpu.dot_dimension_numbers<[1], [0], [0], [1], [0, 0, 1, 1], [], []>} : vector<64x16xbf16>, vector<16x32xbf16>, vector<64x32xf32> -> vector<64x32xf32>
    %c0_125 = arith.constant 0 : index
    %c0_126 = arith.constant 0 : index
    %158 = vector.load %arg9[%c0_125, %c0_126] : memref<1x32xf32, #tpu.memory_space<vmem>>, vector<1x32xf32>
    %159 = vector.broadcast %158 : vector<1x32xf32> to vector<64x32xf32>
    %160 = arith.addf %157, %159 : vector<64x32xf32>
    %cst_127 = arith.constant 0.000000e+00 : f32
    %161 = vector.broadcast %cst_127 : f32 to vector<64x32xf32>
    %162 = arith.maximumf %160, %161 : vector<64x32xf32>
    %cst_128 = arith.constant 6.000000e+00 : f32
    %163 = vector.broadcast %cst_128 : f32 to vector<64x32xf32>
    %164 = arith.minimumf %162, %163 : vector<64x32xf32>
    %c0_129 = arith.constant 0 : index
    %c0_130 = arith.constant 0 : index
    %165 = vector.load %arg10[%c0_129, %c0_130] : memref<9x32xf32, #tpu.memory_space<vmem>>, vector<9x32xf32>
    %cst_131 = arith.constant 0.000000e+00 : f32
    %166 = vector.broadcast %cst_131 : f32 to vector<1x32xf32>
    %cst_132 = arith.constant 0.000000e+00 : f32
    %167 = vector.broadcast %cst_132 : f32 to vector<9x32xf32>
    %168 = vector.extract_strided_slice %164 {offsets = [18, 0], sizes = [1, 32], strides = [1, 1]} : vector<64x32xf32> to vector<1x32xf32>
    %169 = vector.extract_strided_slice %164 {offsets = [21, 0], sizes = [1, 32], strides = [1, 1]} : vector<64x32xf32> to vector<1x32xf32>
    %170 = vector.extract_strided_slice %164 {offsets = [42, 0], sizes = [1, 32], strides = [1, 1]} : vector<64x32xf32> to vector<1x32xf32>
    %171 = vector.extract_strided_slice %164 {offsets = [45, 0], sizes = [1, 32], strides = [1, 1]} : vector<64x32xf32> to vector<1x32xf32>
    %172 = tpu.concatenate %166, %166, %166, %166, %168, %169, %166, %170, %171 in 0 : vector<1x32xf32>, vector<1x32xf32>, vector<1x32xf32>, vector<1x32xf32>, vector<1x32xf32>, vector<1x32xf32>, vector<1x32xf32>, vector<1x32xf32>, vector<1x32xf32> -> vector<9x32xf32>
    %173 = vector.extract_strided_slice %165 {offsets = [0, 0], sizes = [1, 32], strides = [1, 1]} : vector<9x32xf32> to vector<1x32xf32>
    %174 = vector.broadcast %173 : vector<1x32xf32> to vector<9x32xf32>
    %175 = arith.mulf %172, %174 : vector<9x32xf32>
    %176 = arith.addf %167, %175 : vector<9x32xf32>
    %177 = vector.extract_strided_slice %164 {offsets = [16, 0], sizes = [1, 32], strides = [1, 1]} : vector<64x32xf32> to vector<1x32xf32>
    %178 = vector.extract_strided_slice %164 {offsets = [19, 0], sizes = [1, 32], strides = [1, 1]} : vector<64x32xf32> to vector<1x32xf32>
    %179 = vector.extract_strided_slice %164 {offsets = [22, 0], sizes = [1, 32], strides = [1, 1]} : vector<64x32xf32> to vector<1x32xf32>
    %180 = vector.extract_strided_slice %164 {offsets = [40, 0], sizes = [1, 32], strides = [1, 1]} : vector<64x32xf32> to vector<1x32xf32>
    %181 = vector.extract_strided_slice %164 {offsets = [43, 0], sizes = [1, 32], strides = [1, 1]} : vector<64x32xf32> to vector<1x32xf32>
    %182 = vector.extract_strided_slice %164 {offsets = [46, 0], sizes = [1, 32], strides = [1, 1]} : vector<64x32xf32> to vector<1x32xf32>
    %183 = tpu.concatenate %166, %166, %166, %177, %178, %179, %180, %181, %182 in 0 : vector<1x32xf32>, vector<1x32xf32>, vector<1x32xf32>, vector<1x32xf32>, vector<1x32xf32>, vector<1x32xf32>, vector<1x32xf32>, vector<1x32xf32>, vector<1x32xf32> -> vector<9x32xf32>
    %184 = vector.extract_strided_slice %165 {offsets = [1, 0], sizes = [1, 32], strides = [1, 1]} : vector<9x32xf32> to vector<1x32xf32>
    %185 = vector.broadcast %184 : vector<1x32xf32> to vector<9x32xf32>
    %186 = arith.mulf %183, %185 : vector<9x32xf32>
    %187 = arith.addf %176, %186 : vector<9x32xf32>
    %188 = vector.extract_strided_slice %164 {offsets = [17, 0], sizes = [1, 32], strides = [1, 1]} : vector<64x32xf32> to vector<1x32xf32>
    %189 = vector.extract_strided_slice %164 {offsets = [20, 0], sizes = [1, 32], strides = [1, 1]} : vector<64x32xf32> to vector<1x32xf32>
    %190 = vector.extract_strided_slice %164 {offsets = [23, 0], sizes = [1, 32], strides = [1, 1]} : vector<64x32xf32> to vector<1x32xf32>
    %191 = vector.extract_strided_slice %164 {offsets = [41, 0], sizes = [1, 32], strides = [1, 1]} : vector<64x32xf32> to vector<1x32xf32>
    %192 = vector.extract_strided_slice %164 {offsets = [44, 0], sizes = [1, 32], strides = [1, 1]} : vector<64x32xf32> to vector<1x32xf32>
    %193 = vector.extract_strided_slice %164 {offsets = [47, 0], sizes = [1, 32], strides = [1, 1]} : vector<64x32xf32> to vector<1x32xf32>
    %194 = tpu.concatenate %166, %166, %166, %188, %189, %190, %191, %192, %193 in 0 : vector<1x32xf32>, vector<1x32xf32>, vector<1x32xf32>, vector<1x32xf32>, vector<1x32xf32>, vector<1x32xf32>, vector<1x32xf32>, vector<1x32xf32>, vector<1x32xf32> -> vector<9x32xf32>
    %195 = vector.extract_strided_slice %165 {offsets = [2, 0], sizes = [1, 32], strides = [1, 1]} : vector<9x32xf32> to vector<1x32xf32>
    %196 = vector.broadcast %195 : vector<1x32xf32> to vector<9x32xf32>
    %197 = arith.mulf %194, %196 : vector<9x32xf32>
    %198 = arith.addf %187, %197 : vector<9x32xf32>
    %199 = vector.extract_strided_slice %164 {offsets = [2, 0], sizes = [1, 32], strides = [1, 1]} : vector<64x32xf32> to vector<1x32xf32>
    %200 = vector.extract_strided_slice %164 {offsets = [5, 0], sizes = [1, 32], strides = [1, 1]} : vector<64x32xf32> to vector<1x32xf32>
    %201 = vector.extract_strided_slice %164 {offsets = [26, 0], sizes = [1, 32], strides = [1, 1]} : vector<64x32xf32> to vector<1x32xf32>
    %202 = vector.extract_strided_slice %164 {offsets = [29, 0], sizes = [1, 32], strides = [1, 1]} : vector<64x32xf32> to vector<1x32xf32>
    %203 = vector.extract_strided_slice %164 {offsets = [50, 0], sizes = [1, 32], strides = [1, 1]} : vector<64x32xf32> to vector<1x32xf32>
    %204 = vector.extract_strided_slice %164 {offsets = [53, 0], sizes = [1, 32], strides = [1, 1]} : vector<64x32xf32> to vector<1x32xf32>
    %205 = tpu.concatenate %166, %199, %200, %166, %201, %202, %166, %203, %204 in 0 : vector<1x32xf32>, vector<1x32xf32>, vector<1x32xf32>, vector<1x32xf32>, vector<1x32xf32>, vector<1x32xf32>, vector<1x32xf32>, vector<1x32xf32>, vector<1x32xf32> -> vector<9x32xf32>
    %206 = vector.extract_strided_slice %165 {offsets = [3, 0], sizes = [1, 32], strides = [1, 1]} : vector<9x32xf32> to vector<1x32xf32>
    %207 = vector.broadcast %206 : vector<1x32xf32> to vector<9x32xf32>
    %208 = arith.mulf %205, %207 : vector<9x32xf32>
    %209 = arith.addf %198, %208 : vector<9x32xf32>
    %210 = vector.extract_strided_slice %164 {offsets = [0, 0], sizes = [1, 32], strides = [1, 1]} : vector<64x32xf32> to vector<1x32xf32>
    %211 = vector.extract_strided_slice %164 {offsets = [3, 0], sizes = [1, 32], strides = [1, 1]} : vector<64x32xf32> to vector<1x32xf32>
    %212 = vector.extract_strided_slice %164 {offsets = [6, 0], sizes = [1, 32], strides = [1, 1]} : vector<64x32xf32> to vector<1x32xf32>
    %213 = vector.extract_strided_slice %164 {offsets = [24, 0], sizes = [1, 32], strides = [1, 1]} : vector<64x32xf32> to vector<1x32xf32>
    %214 = vector.extract_strided_slice %164 {offsets = [27, 0], sizes = [1, 32], strides = [1, 1]} : vector<64x32xf32> to vector<1x32xf32>
    %215 = vector.extract_strided_slice %164 {offsets = [30, 0], sizes = [1, 32], strides = [1, 1]} : vector<64x32xf32> to vector<1x32xf32>
    %216 = vector.extract_strided_slice %164 {offsets = [48, 0], sizes = [1, 32], strides = [1, 1]} : vector<64x32xf32> to vector<1x32xf32>
    %217 = vector.extract_strided_slice %164 {offsets = [51, 0], sizes = [1, 32], strides = [1, 1]} : vector<64x32xf32> to vector<1x32xf32>
    %218 = vector.extract_strided_slice %164 {offsets = [54, 0], sizes = [1, 32], strides = [1, 1]} : vector<64x32xf32> to vector<1x32xf32>
    %219 = tpu.concatenate %210, %211, %212, %213, %214, %215, %216, %217, %218 in 0 : vector<1x32xf32>, vector<1x32xf32>, vector<1x32xf32>, vector<1x32xf32>, vector<1x32xf32>, vector<1x32xf32>, vector<1x32xf32>, vector<1x32xf32>, vector<1x32xf32> -> vector<9x32xf32>
    %220 = vector.extract_strided_slice %165 {offsets = [4, 0], sizes = [1, 32], strides = [1, 1]} : vector<9x32xf32> to vector<1x32xf32>
    %221 = vector.broadcast %220 : vector<1x32xf32> to vector<9x32xf32>
    %222 = arith.mulf %219, %221 : vector<9x32xf32>
    %223 = arith.addf %209, %222 : vector<9x32xf32>
    %224 = vector.extract_strided_slice %164 {offsets = [1, 0], sizes = [1, 32], strides = [1, 1]} : vector<64x32xf32> to vector<1x32xf32>
    %225 = vector.extract_strided_slice %164 {offsets = [4, 0], sizes = [1, 32], strides = [1, 1]} : vector<64x32xf32> to vector<1x32xf32>
    %226 = vector.extract_strided_slice %164 {offsets = [7, 0], sizes = [1, 32], strides = [1, 1]} : vector<64x32xf32> to vector<1x32xf32>
    %227 = vector.extract_strided_slice %164 {offsets = [25, 0], sizes = [1, 32], strides = [1, 1]} : vector<64x32xf32> to vector<1x32xf32>
    %228 = vector.extract_strided_slice %164 {offsets = [28, 0], sizes = [1, 32], strides = [1, 1]} : vector<64x32xf32> to vector<1x32xf32>
    %229 = vector.extract_strided_slice %164 {offsets = [31, 0], sizes = [1, 32], strides = [1, 1]} : vector<64x32xf32> to vector<1x32xf32>
    %230 = vector.extract_strided_slice %164 {offsets = [49, 0], sizes = [1, 32], strides = [1, 1]} : vector<64x32xf32> to vector<1x32xf32>
    %231 = vector.extract_strided_slice %164 {offsets = [52, 0], sizes = [1, 32], strides = [1, 1]} : vector<64x32xf32> to vector<1x32xf32>
    %232 = vector.extract_strided_slice %164 {offsets = [55, 0], sizes = [1, 32], strides = [1, 1]} : vector<64x32xf32> to vector<1x32xf32>
    %233 = tpu.concatenate %224, %225, %226, %227, %228, %229, %230, %231, %232 in 0 : vector<1x32xf32>, vector<1x32xf32>, vector<1x32xf32>, vector<1x32xf32>, vector<1x32xf32>, vector<1x32xf32>, vector<1x32xf32>, vector<1x32xf32>, vector<1x32xf32> -> vector<9x32xf32>
    %234 = vector.extract_strided_slice %165 {offsets = [5, 0], sizes = [1, 32], strides = [1, 1]} : vector<9x32xf32> to vector<1x32xf32>
    %235 = vector.broadcast %234 : vector<1x32xf32> to vector<9x32xf32>
    %236 = arith.mulf %233, %235 : vector<9x32xf32>
    %237 = arith.addf %223, %236 : vector<9x32xf32>
    %238 = vector.extract_strided_slice %164 {offsets = [10, 0], sizes = [1, 32], strides = [1, 1]} : vector<64x32xf32> to vector<1x32xf32>
    %239 = vector.extract_strided_slice %164 {offsets = [13, 0], sizes = [1, 32], strides = [1, 1]} : vector<64x32xf32> to vector<1x32xf32>
    %240 = vector.extract_strided_slice %164 {offsets = [34, 0], sizes = [1, 32], strides = [1, 1]} : vector<64x32xf32> to vector<1x32xf32>
    %241 = vector.extract_strided_slice %164 {offsets = [37, 0], sizes = [1, 32], strides = [1, 1]} : vector<64x32xf32> to vector<1x32xf32>
    %242 = vector.extract_strided_slice %164 {offsets = [58, 0], sizes = [1, 32], strides = [1, 1]} : vector<64x32xf32> to vector<1x32xf32>
    %243 = vector.extract_strided_slice %164 {offsets = [61, 0], sizes = [1, 32], strides = [1, 1]} : vector<64x32xf32> to vector<1x32xf32>
    %244 = tpu.concatenate %166, %238, %239, %166, %240, %241, %166, %242, %243 in 0 : vector<1x32xf32>, vector<1x32xf32>, vector<1x32xf32>, vector<1x32xf32>, vector<1x32xf32>, vector<1x32xf32>, vector<1x32xf32>, vector<1x32xf32>, vector<1x32xf32> -> vector<9x32xf32>
    %245 = vector.extract_strided_slice %165 {offsets = [6, 0], sizes = [1, 32], strides = [1, 1]} : vector<9x32xf32> to vector<1x32xf32>
    %246 = vector.broadcast %245 : vector<1x32xf32> to vector<9x32xf32>
    %247 = arith.mulf %244, %246 : vector<9x32xf32>
    %248 = arith.addf %237, %247 : vector<9x32xf32>
    %249 = vector.extract_strided_slice %164 {offsets = [8, 0], sizes = [1, 32], strides = [1, 1]} : vector<64x32xf32> to vector<1x32xf32>
    %250 = vector.extract_strided_slice %164 {offsets = [11, 0], sizes = [1, 32], strides = [1, 1]} : vector<64x32xf32> to vector<1x32xf32>
    %251 = vector.extract_strided_slice %164 {offsets = [14, 0], sizes = [1, 32], strides = [1, 1]} : vector<64x32xf32> to vector<1x32xf32>
    %252 = vector.extract_strided_slice %164 {offsets = [32, 0], sizes = [1, 32], strides = [1, 1]} : vector<64x32xf32> to vector<1x32xf32>
    %253 = vector.extract_strided_slice %164 {offsets = [35, 0], sizes = [1, 32], strides = [1, 1]} : vector<64x32xf32> to vector<1x32xf32>
    %254 = vector.extract_strided_slice %164 {offsets = [38, 0], sizes = [1, 32], strides = [1, 1]} : vector<64x32xf32> to vector<1x32xf32>
    %255 = vector.extract_strided_slice %164 {offsets = [56, 0], sizes = [1, 32], strides = [1, 1]} : vector<64x32xf32> to vector<1x32xf32>
    %256 = vector.extract_strided_slice %164 {offsets = [59, 0], sizes = [1, 32], strides = [1, 1]} : vector<64x32xf32> to vector<1x32xf32>
    %257 = vector.extract_strided_slice %164 {offsets = [62, 0], sizes = [1, 32], strides = [1, 1]} : vector<64x32xf32> to vector<1x32xf32>
    %258 = tpu.concatenate %249, %250, %251, %252, %253, %254, %255, %256, %257 in 0 : vector<1x32xf32>, vector<1x32xf32>, vector<1x32xf32>, vector<1x32xf32>, vector<1x32xf32>, vector<1x32xf32>, vector<1x32xf32>, vector<1x32xf32>, vector<1x32xf32> -> vector<9x32xf32>
    %259 = vector.extract_strided_slice %165 {offsets = [7, 0], sizes = [1, 32], strides = [1, 1]} : vector<9x32xf32> to vector<1x32xf32>
    %260 = vector.broadcast %259 : vector<1x32xf32> to vector<9x32xf32>
    %261 = arith.mulf %258, %260 : vector<9x32xf32>
    %262 = arith.addf %248, %261 : vector<9x32xf32>
    %263 = vector.extract_strided_slice %164 {offsets = [9, 0], sizes = [1, 32], strides = [1, 1]} : vector<64x32xf32> to vector<1x32xf32>
    %264 = vector.extract_strided_slice %164 {offsets = [12, 0], sizes = [1, 32], strides = [1, 1]} : vector<64x32xf32> to vector<1x32xf32>
    %265 = vector.extract_strided_slice %164 {offsets = [15, 0], sizes = [1, 32], strides = [1, 1]} : vector<64x32xf32> to vector<1x32xf32>
    %266 = vector.extract_strided_slice %164 {offsets = [33, 0], sizes = [1, 32], strides = [1, 1]} : vector<64x32xf32> to vector<1x32xf32>
    %267 = vector.extract_strided_slice %164 {offsets = [36, 0], sizes = [1, 32], strides = [1, 1]} : vector<64x32xf32> to vector<1x32xf32>
    %268 = vector.extract_strided_slice %164 {offsets = [39, 0], sizes = [1, 32], strides = [1, 1]} : vector<64x32xf32> to vector<1x32xf32>
    %269 = vector.extract_strided_slice %164 {offsets = [57, 0], sizes = [1, 32], strides = [1, 1]} : vector<64x32xf32> to vector<1x32xf32>
    %270 = vector.extract_strided_slice %164 {offsets = [60, 0], sizes = [1, 32], strides = [1, 1]} : vector<64x32xf32> to vector<1x32xf32>
    %271 = vector.extract_strided_slice %164 {offsets = [63, 0], sizes = [1, 32], strides = [1, 1]} : vector<64x32xf32> to vector<1x32xf32>
    %272 = tpu.concatenate %263, %264, %265, %266, %267, %268, %269, %270, %271 in 0 : vector<1x32xf32>, vector<1x32xf32>, vector<1x32xf32>, vector<1x32xf32>, vector<1x32xf32>, vector<1x32xf32>, vector<1x32xf32>, vector<1x32xf32>, vector<1x32xf32> -> vector<9x32xf32>
    %273 = vector.extract_strided_slice %165 {offsets = [8, 0], sizes = [1, 32], strides = [1, 1]} : vector<9x32xf32> to vector<1x32xf32>
    %274 = vector.broadcast %273 : vector<1x32xf32> to vector<9x32xf32>
    %275 = arith.mulf %272, %274 : vector<9x32xf32>
    %276 = arith.addf %262, %275 : vector<9x32xf32>
    %c0_133 = arith.constant 0 : index
    %c0_134 = arith.constant 0 : index
    %277 = vector.load %arg11[%c0_133, %c0_134] : memref<1x32xf32, #tpu.memory_space<vmem>>, vector<1x32xf32>
    %278 = vector.broadcast %277 : vector<1x32xf32> to vector<9x32xf32>
    %279 = arith.addf %276, %278 : vector<9x32xf32>
    %cst_135 = arith.constant 0.000000e+00 : f32
    %280 = vector.broadcast %cst_135 : f32 to vector<9x32xf32>
    %281 = arith.maximumf %279, %280 : vector<9x32xf32>
    %cst_136 = arith.constant 6.000000e+00 : f32
    %282 = vector.broadcast %cst_136 : f32 to vector<9x32xf32>
    %283 = arith.minimumf %281, %282 : vector<9x32xf32>
    %284 = arith.truncf %283 : vector<9x32xf32> to vector<9x32xbf16>
    %c0_137 = arith.constant 0 : index
    %c0_138 = arith.constant 0 : index
    %285 = vector.load %arg12[%c0_137, %c0_138] : memref<32x24xbf16, #tpu.memory_space<vmem>>, vector<32x24xbf16>
    %cst_139 = arith.constant dense<0.000000e+00> : vector<9x24xf32>
    %286 = tpu.matmul %284, %285, %cst_139 {dimension_numbers = #tpu.dot_dimension_numbers<[1], [0], [0], [1], [0, 0, 1, 1], [], []>} : vector<9x32xbf16>, vector<32x24xbf16>, vector<9x24xf32> -> vector<9x24xf32>
    %c0_140 = arith.constant 0 : index
    %c0_141 = arith.constant 0 : index
    %287 = vector.load %arg13[%c0_140, %c0_141] : memref<1x24xf32, #tpu.memory_space<vmem>>, vector<1x24xf32>
    %288 = vector.broadcast %287 : vector<1x24xf32> to vector<9x24xf32>
    %289 = arith.addf %286, %288 : vector<9x24xf32>
    %cst_142 = arith.constant 0.000000e+00 : f32
    %290 = vector.broadcast %cst_142 : f32 to vector<1x24xf32>
    %cst_143 = arith.constant 0.000000e+00 : f32
    %291 = vector.broadcast %cst_143 : f32 to vector<4x128xf32>
    %292 = vector.extract_strided_slice %289 {offsets = [4, 0], sizes = [1, 24], strides = [1, 1]} : vector<9x24xf32> to vector<1x24xf32>
    %293 = tpu.concatenate %290, %290, %290, %292 in 0 : vector<1x24xf32>, vector<1x24xf32>, vector<1x24xf32>, vector<1x24xf32> -> vector<4x24xf32>
    %294 = arith.truncf %293 : vector<4x24xf32> to vector<4x24xbf16>
    %c0_144 = arith.constant 0 : index
    %c0_145 = arith.constant 0 : index
    %c0_146 = arith.constant 0 : index
    %295 = vector.load %arg14[%c0_144, %c0_145, %c0_146] : memref<9x24x128xbf16, #tpu.memory_space<vmem>>, vector<1x24x128xbf16>
    %296 = vector.shape_cast %295 : vector<1x24x128xbf16> to vector<24x128xbf16>
    %cst_147 = arith.constant dense<0.000000e+00> : vector<4x128xf32>
    %297 = tpu.matmul %294, %296, %cst_147 {dimension_numbers = #tpu.dot_dimension_numbers<[1], [0], [0], [1], [0, 0, 1, 1], [], []>} : vector<4x24xbf16>, vector<24x128xbf16>, vector<4x128xf32> -> vector<4x128xf32>
    %298 = arith.addf %291, %297 : vector<4x128xf32>
    %299 = vector.extract_strided_slice %289 {offsets = [3, 0], sizes = [1, 24], strides = [1, 1]} : vector<9x24xf32> to vector<1x24xf32>
    %300 = vector.extract_strided_slice %289 {offsets = [5, 0], sizes = [1, 24], strides = [1, 1]} : vector<9x24xf32> to vector<1x24xf32>
    %301 = tpu.concatenate %290, %290, %299, %300 in 0 : vector<1x24xf32>, vector<1x24xf32>, vector<1x24xf32>, vector<1x24xf32> -> vector<4x24xf32>
    %302 = arith.truncf %301 : vector<4x24xf32> to vector<4x24xbf16>
    %c1_148 = arith.constant 1 : index
    %c0_149 = arith.constant 0 : index
    %c0_150 = arith.constant 0 : index
    %303 = vector.load %arg14[%c1_148, %c0_149, %c0_150] : memref<9x24x128xbf16, #tpu.memory_space<vmem>>, vector<1x24x128xbf16>
    %304 = vector.shape_cast %303 : vector<1x24x128xbf16> to vector<24x128xbf16>
    %cst_151 = arith.constant dense<0.000000e+00> : vector<4x128xf32>
    %305 = tpu.matmul %302, %304, %cst_151 {dimension_numbers = #tpu.dot_dimension_numbers<[1], [0], [0], [1], [0, 0, 1, 1], [], []>} : vector<4x24xbf16>, vector<24x128xbf16>, vector<4x128xf32> -> vector<4x128xf32>
    %306 = arith.addf %298, %305 : vector<4x128xf32>
    %307 = vector.extract_strided_slice %289 {offsets = [4, 0], sizes = [1, 24], strides = [1, 1]} : vector<9x24xf32> to vector<1x24xf32>
    %308 = tpu.concatenate %290, %290, %307, %290 in 0 : vector<1x24xf32>, vector<1x24xf32>, vector<1x24xf32>, vector<1x24xf32> -> vector<4x24xf32>
    %309 = arith.truncf %308 : vector<4x24xf32> to vector<4x24xbf16>
    %c2_152 = arith.constant 2 : index
    %c0_153 = arith.constant 0 : index
    %c0_154 = arith.constant 0 : index
    %310 = vector.load %arg14[%c2_152, %c0_153, %c0_154] : memref<9x24x128xbf16, #tpu.memory_space<vmem>>, vector<1x24x128xbf16>
    %311 = vector.shape_cast %310 : vector<1x24x128xbf16> to vector<24x128xbf16>
    %cst_155 = arith.constant dense<0.000000e+00> : vector<4x128xf32>
    %312 = tpu.matmul %309, %311, %cst_155 {dimension_numbers = #tpu.dot_dimension_numbers<[1], [0], [0], [1], [0, 0, 1, 1], [], []>} : vector<4x24xbf16>, vector<24x128xbf16>, vector<4x128xf32> -> vector<4x128xf32>
    %313 = arith.addf %306, %312 : vector<4x128xf32>
    %314 = vector.extract_strided_slice %289 {offsets = [1, 0], sizes = [1, 24], strides = [1, 1]} : vector<9x24xf32> to vector<1x24xf32>
    %315 = vector.extract_strided_slice %289 {offsets = [7, 0], sizes = [1, 24], strides = [1, 1]} : vector<9x24xf32> to vector<1x24xf32>
    %316 = tpu.concatenate %290, %314, %290, %315 in 0 : vector<1x24xf32>, vector<1x24xf32>, vector<1x24xf32>, vector<1x24xf32> -> vector<4x24xf32>
    %317 = arith.truncf %316 : vector<4x24xf32> to vector<4x24xbf16>
    %c3_156 = arith.constant 3 : index
    %c0_157 = arith.constant 0 : index
    %c0_158 = arith.constant 0 : index
    %318 = vector.load %arg14[%c3_156, %c0_157, %c0_158] : memref<9x24x128xbf16, #tpu.memory_space<vmem>>, vector<1x24x128xbf16>
    %319 = vector.shape_cast %318 : vector<1x24x128xbf16> to vector<24x128xbf16>
    %cst_159 = arith.constant dense<0.000000e+00> : vector<4x128xf32>
    %320 = tpu.matmul %317, %319, %cst_159 {dimension_numbers = #tpu.dot_dimension_numbers<[1], [0], [0], [1], [0, 0, 1, 1], [], []>} : vector<4x24xbf16>, vector<24x128xbf16>, vector<4x128xf32> -> vector<4x128xf32>
    %321 = arith.addf %313, %320 : vector<4x128xf32>
    %322 = vector.extract_strided_slice %289 {offsets = [0, 0], sizes = [1, 24], strides = [1, 1]} : vector<9x24xf32> to vector<1x24xf32>
    %323 = vector.extract_strided_slice %289 {offsets = [2, 0], sizes = [1, 24], strides = [1, 1]} : vector<9x24xf32> to vector<1x24xf32>
    %324 = vector.extract_strided_slice %289 {offsets = [6, 0], sizes = [1, 24], strides = [1, 1]} : vector<9x24xf32> to vector<1x24xf32>
    %325 = vector.extract_strided_slice %289 {offsets = [8, 0], sizes = [1, 24], strides = [1, 1]} : vector<9x24xf32> to vector<1x24xf32>
    %326 = tpu.concatenate %322, %323, %324, %325 in 0 : vector<1x24xf32>, vector<1x24xf32>, vector<1x24xf32>, vector<1x24xf32> -> vector<4x24xf32>
    %327 = arith.truncf %326 : vector<4x24xf32> to vector<4x24xbf16>
    %c4_160 = arith.constant 4 : index
    %c0_161 = arith.constant 0 : index
    %c0_162 = arith.constant 0 : index
    %328 = vector.load %arg14[%c4_160, %c0_161, %c0_162] : memref<9x24x128xbf16, #tpu.memory_space<vmem>>, vector<1x24x128xbf16>
    %329 = vector.shape_cast %328 : vector<1x24x128xbf16> to vector<24x128xbf16>
    %cst_163 = arith.constant dense<0.000000e+00> : vector<4x128xf32>
    %330 = tpu.matmul %327, %329, %cst_163 {dimension_numbers = #tpu.dot_dimension_numbers<[1], [0], [0], [1], [0, 0, 1, 1], [], []>} : vector<4x24xbf16>, vector<24x128xbf16>, vector<4x128xf32> -> vector<4x128xf32>
    %331 = arith.addf %321, %330 : vector<4x128xf32>
    %332 = vector.extract_strided_slice %289 {offsets = [1, 0], sizes = [1, 24], strides = [1, 1]} : vector<9x24xf32> to vector<1x24xf32>
    %333 = vector.extract_strided_slice %289 {offsets = [7, 0], sizes = [1, 24], strides = [1, 1]} : vector<9x24xf32> to vector<1x24xf32>
    %334 = tpu.concatenate %332, %290, %333, %290 in 0 : vector<1x24xf32>, vector<1x24xf32>, vector<1x24xf32>, vector<1x24xf32> -> vector<4x24xf32>
    %335 = arith.truncf %334 : vector<4x24xf32> to vector<4x24xbf16>
    %c5_164 = arith.constant 5 : index
    %c0_165 = arith.constant 0 : index
    %c0_166 = arith.constant 0 : index
    %336 = vector.load %arg14[%c5_164, %c0_165, %c0_166] : memref<9x24x128xbf16, #tpu.memory_space<vmem>>, vector<1x24x128xbf16>
    %337 = vector.shape_cast %336 : vector<1x24x128xbf16> to vector<24x128xbf16>
    %cst_167 = arith.constant dense<0.000000e+00> : vector<4x128xf32>
    %338 = tpu.matmul %335, %337, %cst_167 {dimension_numbers = #tpu.dot_dimension_numbers<[1], [0], [0], [1], [0, 0, 1, 1], [], []>} : vector<4x24xbf16>, vector<24x128xbf16>, vector<4x128xf32> -> vector<4x128xf32>
    %339 = arith.addf %331, %338 : vector<4x128xf32>
    %340 = vector.extract_strided_slice %289 {offsets = [4, 0], sizes = [1, 24], strides = [1, 1]} : vector<9x24xf32> to vector<1x24xf32>
    %341 = tpu.concatenate %290, %340, %290, %290 in 0 : vector<1x24xf32>, vector<1x24xf32>, vector<1x24xf32>, vector<1x24xf32> -> vector<4x24xf32>
    %342 = arith.truncf %341 : vector<4x24xf32> to vector<4x24xbf16>
    %c6_168 = arith.constant 6 : index
    %c0_169 = arith.constant 0 : index
    %c0_170 = arith.constant 0 : index
    %343 = vector.load %arg14[%c6_168, %c0_169, %c0_170] : memref<9x24x128xbf16, #tpu.memory_space<vmem>>, vector<1x24x128xbf16>
    %344 = vector.shape_cast %343 : vector<1x24x128xbf16> to vector<24x128xbf16>
    %cst_171 = arith.constant dense<0.000000e+00> : vector<4x128xf32>
    %345 = tpu.matmul %342, %344, %cst_171 {dimension_numbers = #tpu.dot_dimension_numbers<[1], [0], [0], [1], [0, 0, 1, 1], [], []>} : vector<4x24xbf16>, vector<24x128xbf16>, vector<4x128xf32> -> vector<4x128xf32>
    %346 = arith.addf %339, %345 : vector<4x128xf32>
    %347 = vector.extract_strided_slice %289 {offsets = [3, 0], sizes = [1, 24], strides = [1, 1]} : vector<9x24xf32> to vector<1x24xf32>
    %348 = vector.extract_strided_slice %289 {offsets = [5, 0], sizes = [1, 24], strides = [1, 1]} : vector<9x24xf32> to vector<1x24xf32>
    %349 = tpu.concatenate %347, %348, %290, %290 in 0 : vector<1x24xf32>, vector<1x24xf32>, vector<1x24xf32>, vector<1x24xf32> -> vector<4x24xf32>
    %350 = arith.truncf %349 : vector<4x24xf32> to vector<4x24xbf16>
    %c7_172 = arith.constant 7 : index
    %c0_173 = arith.constant 0 : index
    %c0_174 = arith.constant 0 : index
    %351 = vector.load %arg14[%c7_172, %c0_173, %c0_174] : memref<9x24x128xbf16, #tpu.memory_space<vmem>>, vector<1x24x128xbf16>
    %352 = vector.shape_cast %351 : vector<1x24x128xbf16> to vector<24x128xbf16>
    %cst_175 = arith.constant dense<0.000000e+00> : vector<4x128xf32>
    %353 = tpu.matmul %350, %352, %cst_175 {dimension_numbers = #tpu.dot_dimension_numbers<[1], [0], [0], [1], [0, 0, 1, 1], [], []>} : vector<4x24xbf16>, vector<24x128xbf16>, vector<4x128xf32> -> vector<4x128xf32>
    %354 = arith.addf %346, %353 : vector<4x128xf32>
    %355 = vector.extract_strided_slice %289 {offsets = [4, 0], sizes = [1, 24], strides = [1, 1]} : vector<9x24xf32> to vector<1x24xf32>
    %356 = tpu.concatenate %355, %290, %290, %290 in 0 : vector<1x24xf32>, vector<1x24xf32>, vector<1x24xf32>, vector<1x24xf32> -> vector<4x24xf32>
    %357 = arith.truncf %356 : vector<4x24xf32> to vector<4x24xbf16>
    %c8_176 = arith.constant 8 : index
    %c0_177 = arith.constant 0 : index
    %c0_178 = arith.constant 0 : index
    %358 = vector.load %arg14[%c8_176, %c0_177, %c0_178] : memref<9x24x128xbf16, #tpu.memory_space<vmem>>, vector<1x24x128xbf16>
    %359 = vector.shape_cast %358 : vector<1x24x128xbf16> to vector<24x128xbf16>
    %cst_179 = arith.constant dense<0.000000e+00> : vector<4x128xf32>
    %360 = tpu.matmul %357, %359, %cst_179 {dimension_numbers = #tpu.dot_dimension_numbers<[1], [0], [0], [1], [0, 0, 1, 1], [], []>} : vector<4x24xbf16>, vector<24x128xbf16>, vector<4x128xf32> -> vector<4x128xf32>
    %361 = arith.addf %354, %360 : vector<4x128xf32>
    %c0_180 = arith.constant 0 : index
    %c0_181 = arith.constant 0 : index
    %362 = vector.load %arg15[%c0_180, %c0_181] : memref<1x128xf32, #tpu.memory_space<vmem>>, vector<1x128xf32>
    %363 = vector.broadcast %362 : vector<1x128xf32> to vector<4x128xf32>
    %364 = arith.addf %361, %363 : vector<4x128xf32>
    %cst_182 = arith.constant 0.000000e+00 : f32
    %365 = vector.broadcast %cst_182 : f32 to vector<4x128xf32>
    %366 = arith.maximumf %364, %365 : vector<4x128xf32>
    %cst_183 = arith.constant 6.000000e+00 : f32
    %367 = vector.broadcast %cst_183 : f32 to vector<4x128xf32>
    %368 = arith.minimumf %366, %367 : vector<4x128xf32>
    %369 = vector.extract_strided_slice %368 {offsets = [0, 0], sizes = [1, 128], strides = [1, 1]} : vector<4x128xf32> to vector<1x128xf32>
    %370 = vector.extract_strided_slice %368 {offsets = [1, 0], sizes = [1, 128], strides = [1, 1]} : vector<4x128xf32> to vector<1x128xf32>
    %371 = arith.addf %369, %370 : vector<1x128xf32>
    %372 = vector.extract_strided_slice %368 {offsets = [2, 0], sizes = [1, 128], strides = [1, 1]} : vector<4x128xf32> to vector<1x128xf32>
    %373 = arith.addf %371, %372 : vector<1x128xf32>
    %374 = vector.extract_strided_slice %368 {offsets = [3, 0], sizes = [1, 128], strides = [1, 1]} : vector<4x128xf32> to vector<1x128xf32>
    %375 = arith.addf %373, %374 : vector<1x128xf32>
    %cst_184 = arith.constant 2.500000e-01 : f32
    %376 = vector.broadcast %cst_184 : f32 to vector<1x128xf32>
    %377 = arith.mulf %375, %376 : vector<1x128xf32>
    %378 = arith.truncf %377 : vector<1x128xf32> to vector<1x128xbf16>
    %c0_185 = arith.constant 0 : index
    %c0_186 = arith.constant 0 : index
    %379 = vector.load %arg16[%c0_185, %c0_186] : memref<128x128xbf16, #tpu.memory_space<vmem>>, vector<128x128xbf16>
    %cst_187 = arith.constant dense<0.000000e+00> : vector<1x128xf32>
    %380 = tpu.matmul %378, %379, %cst_187 {dimension_numbers = #tpu.dot_dimension_numbers<[1], [0], [0], [1], [0, 0, 1, 1], [], []>} : vector<1x128xbf16>, vector<128x128xbf16>, vector<1x128xf32> -> vector<1x128xf32>
    %c0_188 = arith.constant 0 : index
    %c0_189 = arith.constant 0 : index
    %381 = vector.load %arg17[%c0_188, %c0_189] : memref<1x128xf32, #tpu.memory_space<vmem>>, vector<1x128xf32>
    %382 = arith.addf %380, %381 : vector<1x128xf32>
    %c0_190 = arith.constant 0 : index
    %c0_191 = arith.constant 0 : index
    %c0_192 = arith.constant 0 : index
    %383 = vector.load %arg18[%c0_190, %c0_191, %c0_192] : memref<1x1x128xf32, #tpu.memory_space<vmem>>, vector<1x1x128xf32>
    %384 = vector.shape_cast %383 : vector<1x1x128xf32> to vector<1x128xf32>
    %385 = vector.shape_cast %382 : vector<1x128xf32> to vector<1x1x128xf32>
    tpu.vector_store %arg18[%c0_190, %c0_191, %c0_192], %385 {strides = array<i32>} : memref<1x1x128xf32, #tpu.memory_space<vmem>>, vector<1x1x128xf32>,
    return
  }
  func.func @transform_0(%arg0: i32) -> (i32, i32, i32, i32, i32) {
    %c0_i32 = arith.constant 0 : i32
    %c0_i32_0 = arith.constant 0 : i32
    %c0_i32_1 = arith.constant 0 : i32
    %c0_i32_2 = arith.constant 0 : i32
    %c0_i32_3 = arith.constant 0 : i32
    return %arg0, %c0_i32, %c0_i32_0, %c0_i32_1, %c0_i32_2 : i32, i32, i32, i32, i32
  }
  func.func @transform_1(%arg0: i32) -> (i32, i32, i32) {
    %c0_i32 = arith.constant 0 : i32
    %c0_i32_0 = arith.constant 0 : i32
    %c0_i32_1 = arith.constant 0 : i32
    %c0_i32_2 = arith.constant 0 : i32
    return %c0_i32, %c0_i32_0, %c0_i32_1 : i32, i32, i32
  }
  func.func @transform_2(%arg0: i32) -> (i32, i32) {
    %c0_i32 = arith.constant 0 : i32
    %c0_i32_0 = arith.constant 0 : i32
    %c0_i32_1 = arith.constant 0 : i32
    return %c0_i32, %c0_i32_0 : i32, i32
  }
  func.func @transform_3(%arg0: i32) -> (i32, i32) {
    %c0_i32 = arith.constant 0 : i32
    %c0_i32_0 = arith.constant 0 : i32
    %c0_i32_1 = arith.constant 0 : i32
    return %c0_i32, %c0_i32_0 : i32, i32
  }
  func.func @transform_4(%arg0: i32) -> (i32, i32) {
    %c0_i32 = arith.constant 0 : i32
    %c0_i32_0 = arith.constant 0 : i32
    %c0_i32_1 = arith.constant 0 : i32
    return %c0_i32, %c0_i32_0 : i32, i32
  }
  func.func @transform_5(%arg0: i32) -> (i32, i32) {
    %c0_i32 = arith.constant 0 : i32
    %c0_i32_0 = arith.constant 0 : i32
    %c0_i32_1 = arith.constant 0 : i32
    return %c0_i32, %c0_i32_0 : i32, i32
  }
  func.func @transform_6(%arg0: i32) -> (i32, i32) {
    %c0_i32 = arith.constant 0 : i32
    %c0_i32_0 = arith.constant 0 : i32
    %c0_i32_1 = arith.constant 0 : i32
    return %c0_i32, %c0_i32_0 : i32, i32
  }
  func.func @transform_7(%arg0: i32) -> (i32, i32) {
    %c0_i32 = arith.constant 0 : i32
    %c0_i32_0 = arith.constant 0 : i32
    %c0_i32_1 = arith.constant 0 : i32
    return %c0_i32, %c0_i32_0 : i32, i32
  }
  func.func @transform_8(%arg0: i32) -> (i32, i32) {
    %c0_i32 = arith.constant 0 : i32
    %c0_i32_0 = arith.constant 0 : i32
    %c0_i32_1 = arith.constant 0 : i32
    return %c0_i32, %c0_i32_0 : i32, i32
  }
  func.func @transform_9(%arg0: i32) -> (i32, i32) {
    %c0_i32 = arith.constant 0 : i32
    %c0_i32_0 = arith.constant 0 : i32
    %c0_i32_1 = arith.constant 0 : i32
    return %c0_i32, %c0_i32_0 : i32, i32
  }
  func.func @transform_10(%arg0: i32) -> (i32, i32) {
    %c0_i32 = arith.constant 0 : i32
    %c0_i32_0 = arith.constant 0 : i32
    %c0_i32_1 = arith.constant 0 : i32
    return %c0_i32, %c0_i32_0 : i32, i32
  }
  func.func @transform_11(%arg0: i32) -> (i32, i32) {
    %c0_i32 = arith.constant 0 : i32
    %c0_i32_0 = arith.constant 0 : i32
    %c0_i32_1 = arith.constant 0 : i32
    return %c0_i32, %c0_i32_0 : i32, i32
  }
  func.func @transform_12(%arg0: i32) -> (i32, i32) {
    %c0_i32 = arith.constant 0 : i32
    %c0_i32_0 = arith.constant 0 : i32
    %c0_i32_1 = arith.constant 0 : i32
    return %c0_i32, %c0_i32_0 : i32, i32
  }
  func.func @transform_13(%arg0: i32) -> (i32, i32, i32) {
    %c0_i32 = arith.constant 0 : i32
    %c0_i32_0 = arith.constant 0 : i32
    %c0_i32_1 = arith.constant 0 : i32
    %c0_i32_2 = arith.constant 0 : i32
    return %c0_i32, %c0_i32_0, %c0_i32_1 : i32, i32, i32
  }
  func.func @transform_14(%arg0: i32) -> (i32, i32) {
    %c0_i32 = arith.constant 0 : i32
    %c0_i32_0 = arith.constant 0 : i32
    %c0_i32_1 = arith.constant 0 : i32
    return %c0_i32, %c0_i32_0 : i32, i32
  }
  func.func @transform_15(%arg0: i32) -> (i32, i32) {
    %c0_i32 = arith.constant 0 : i32
    %c0_i32_0 = arith.constant 0 : i32
    %c0_i32_1 = arith.constant 0 : i32
    return %c0_i32, %c0_i32_0 : i32, i32
  }
  func.func @transform_16(%arg0: i32) -> (i32, i32) {
    %c0_i32 = arith.constant 0 : i32
    %c0_i32_0 = arith.constant 0 : i32
    %c0_i32_1 = arith.constant 0 : i32
    return %c0_i32, %c0_i32_0 : i32, i32
  }
  func.func @transform_17(%arg0: i32) -> (i32, i32, i32) {
    %c0_i32 = arith.constant 0 : i32
    %c0_i32_0 = arith.constant 0 : i32
    %c0_i32_1 = arith.constant 0 : i32
    return %arg0, %c0_i32, %c0_i32_0 : i32, i32, i32
  }
}

</mosaic_0001>

<bundles_post_ra>
// kernel: mobilenetv2_forward.1
= control target key start
LH: loop header
LB: loop body
LE: loop exit
PB: predicated region body
PF: predicated region fallthrough
CT: control target
= control target key end

     0   :  { %s3646_s0 = inlined_call_operand.vmem [shape: f32[2,4,9,9,3], index: 0, kind: input, shape index: {}]   ;;  %s3647_s1 = inlined_call_operand.vmem [shape: bf16[9,3,32], index: 1, kind: input, shape index: {}]   ;;  %s3648_s2 = inlined_call_operand.vmem [shape: f32[1,32], index: 2, kind: input, shape index: {}]   ;;  %s3649_s3 = inlined_call_operand.vmem [shape: f32[9,32], index: 3, kind: input, shape index: {}]   ;;  %s3650_s4 = inlined_call_operand.vmem [shape: f32[1,32], index: 4, kind: input, shape index: {}]   ;;  %s3651_s5 = inlined_call_operand.vmem [shape: bf16[32,16], index: 5, kind: input, shape index: {}]   ;;  %s3652_s6 = inlined_call_operand.vmem [shape: f32[1,16], index: 6, kind: input, shape index: {}]   ;;  %s3653_s7 = inlined_call_operand.vmem [shape: bf16[16,32], index: 7, kind: input, shape index: {}]   ;;  %s3654_s8 = inlined_call_operand.vmem [shape: f32[1,32], index: 8, kind: input, shape index: {}]   ;;  %s3655_s9 = inlined_call_operand.vmem [shape: f32[9,32], index: 9, kind: input, shape index: {}]   ;;  %s3656_s10 = inlined_call_operand.vmem [shape: f32[1,32], index: 10, kind: input, shape index: {}]   ;;  %s3657_s11 = inlined_call_operand.vmem [shape: bf16[32,24], index: 11, kind: input, shape index: {}]   ;;  %s3658_s12 = inlined_call_operand.vmem [shape: f32[1,24], index: 12, kind: input, shape index: {}]   ;;  %s3659_s13 = inlined_call_operand.vmem [shape: bf16[9,24,128], index: 13, kind: input, shape index: {}]   ;;  %s3660_s14 = inlined_call_operand.vmem [shape: f32[1,128], index: 14, kind: input, shape index: {}]   ;;  %s3661_s15 = inlined_call_operand.vmem [shape: bf16[128,128], index: 15, kind: input, shape index: {}]   ;;  %s3662_s16 = inlined_call_operand.vmem [shape: f32[1,128], index: 16, kind: input, shape index: {}]   ;;  %s3663_s17 = inlined_call_operand.hbm [shape: f32[2,1,128], index: 17, kind: output, shape index: {}]  }
   0x1   :  { %3669 = sst [smem:[#allocation10_spill]] %s3646_s0 }
   0x2   :  { %3670 = sst [smem:[#allocation11_spill]] %s3647_s1 }
   0x3   :  { %3671 = sst [smem:[#allocation12_spill]] %s3648_s2 }
   0x4   :  { %3672 = sst [smem:[#allocation13_spill]] %s3649_s3 }
   0x5   :  { %3673 = sst [smem:[#allocation14_spill]] %s3650_s4 }
   0x6   :  { %22 = vsyncpa [#allocation4], 0 }
   0x7   :  { %24 = vsyncpa [#allocation4 + $0x1], 0  ;;  %s2812_s24 = smov 0   ;;  %s2814_s25 = smov 0  }
   0x8   :  { %s2816_s26 = smov 0   ;;  %s2818_s27 = smov 0  }
   0x9 LB: > { %3674 = sst [smem:[#allocation6_spill]] %s2714_s26  ;;  %s2833_s28 = sadd.s32 4294967295, %s2718_s27   ;;  %s2718_s27 = sphi %s2818_s27, %s3686_s27   ;;  %s2714_s26 = sphi %s2816_s26, %s3688_s26   ;;  %s2710_s25 = sphi %s2814_s25, %s3690_s25   ;;  %s2706_s24 = sphi %s2812_s24, %s3689_s24  }
   0xa   : > { %s2345_s29 = sadd.s32 4294967294, %s2718_s27   ;;  %s2837_s0 = sadd.s32 1, %s2718_s27  }
   0xb   : > { %3675 = sst [smem:[#allocation7_spill]] %s2837_s0  ;;  %s399_s30 = sadd.s32 1, %s2714_s26 }
   0xc   : > { %s396_s18 = ssub.s32 %s2718_s27, %s2837_s0  ;;  %p409_p0 = scmp.ne.s32.totalorder %s2714_s26, %s2710_s25 }
   0xd   : > { %p397_p1 = scmp.eq.s32.totalorder %s396_s18, 0  ;;  %p410_p2 = scmp.eq.s32.totalorder %s2833_s28, 1 }
   0xe   : > { %p415_p3 = scmp.ne.s32.totalorder %s2710_s25, %s2706_s24  ;;  %p416_p4 = scmp.eq.s32.totalorder %s2345_s29, 1 }
   0xf   : > { %s2848_s19 = scalar_select %p397_p1, %s2714_s26, %s399_s30  }
  0x10   : > { %p2850_p5 = por %p410_p2, %p409_p0  ;;  %p2854_p6 = por %p416_p4, %p415_p3 }
  0x11   : > { %3676 = sst [smem:[#allocation8_spill]] %s2848_s19  ;;  %p2348_p7 = scmp.ge.s32.totalorder %s2718_s27, 1 }
  0x12   : > { %s3678_s20 = scalar_select %p2854_p6, 1, 0 }
  0x13   : > { %p490_p8 = scmp.lt.s32.totalorder %s2718_s27, 3 }
  0x14   : > { %3679 = sst [smem:[#allocation9_spill]] %s3678_s20 }
  0x15   : > { %p491_p9 = pnand %p2348_p7, %p490_p8 }
  0x16   : > { %s3680_s23 = sld [smem:[#allocation11_spill]] (!%p491_p9)  ;;  %p541_p10 = scmp.lt.s32.totalorder (!%p491_p9), %s2833_s28, 1 }
  0x17   : > { %494 = sbr.rel (%p491_p9) target bundleno = 1174 (0x496), region = 88  ;;  %s3681_s30 = sld [smem:[#allocation10_spill]] (!%p491_p9) }
  0x18   : > { %s3682_s2 = sld [smem:[#allocation12_spill]] (!%p491_p9)  ;;  %s539_s29 = sand.u32 (!%p491_p9), 1, %s2710_s25  }
  0x19   : > { %s3683_s3 = sld [smem:[#allocation13_spill]] (!%p491_p9)  ;;  %s2286_s20 = scalar_lea.hbm (!%p491_p9), %s3663_s17, %s2833_s28 }
  0x1a   : > { %s3684_s4 = sld [smem:[#allocation14_spill]] (!%p491_p9)  ;;  %s2278_s26 = scalar_lea.sflag (!%p491_p9), [#allocation4], %s539_s29 }
  0x1c   : > { %v2358_v0 = vld [vmem:[%s3680_s23 + $0x2] sm:$0x3]  ;;  %vm588_vm0 = vcmask 1040384   ;;  %vm589_vm1 = vcmask 1041408   ;;  %v2720_v1 = vmov 65535   ;;  %s542_s21 = scalar_select %p541_p10, %s2833_s28, 1 }
  0x1d   : > { %v590_v2 = vsel %vm588_vm0, 4294967295, %v2720_v1  ;;  %v559_v3 = vld [vmem:[%s3680_s23] sm:$0x3]  ;;  %v2367_v4 = vld [vmem:[%s3680_s23 + $0x4] sm:$0x3]  ;;  %vm575_vm2 = vcmask 23552  }
  0x1e   : > { %v2872_v5 = vsel %vm589_vm1, %v590_v2, 0  ;;  %v2393_v6 = vld [vmem:[%s3680_s23 + $0x8] sm:$0x3]  ;;  %v2380_v7 = vld [vmem:[%s3680_s23 + $0x6] sm:$0x3]  ;;  %s2605_s19 = smul.u32 576, %s542_s21 }
  0x1f   : > { %v593_v8 = vand.u32 %v2358_v0, %v2872_v5  ;;  %v637_v9 = vand.u32 %v2872_v5, %v559_v3  ;;  %v695_v10 = vand.u32 %v2367_v4, %v2872_v5  ;;  %v829_v11 = vand.u32 %v2393_v6, %v2872_v5  ;;  %v2432_v37 = vld [vmem:[%s3680_s23 + $0xe] sm:$0x3]  ;;  %v2406_v38 = vld [vmem:[%s3680_s23 + $0xa] sm:$0x3]  ;;  %v2419_v39 = vld [vmem:[%s3680_s23 + $0xc] sm:$0x3] }
  0x20   : > { %v762_v12 = vand.u32 %v2380_v7, %v2872_v5  ;;  %s2889_s0 = scalar_lea.vmem %s3681_s30, %s2605_s19  ;;  %v1029_v40 = vand.u32 %v2432_v37, %v2872_v5  ;;  %v895_v41 = vand.u32 %v2406_v38, %v2872_v5  ;;  %v962_v42 = vand.u32 %v2419_v39, %v2872_v5  ;;  %v2445_v55 = vld [vmem:[%s3680_s23 + $0x10] sm:$0x3]  ;;  %s2290_s19 = sshll.u32 %s2286_s20, 4  ;;  %s2291_s19 = int_to_ptr.hbm [resolvable:$true] %s2290_s19 }
  0x21   : > { %602 = vmatpush.bf16.msra.mxu0 %v593_v8  ;;  %646 = vmatpush.bf16.msra.mxu1 %v637_v9  ;;  %v2350_v13 = vld [vmem:[%s2889_s0 + $0x90] sm:$0xff]  ;;  %v2893_v14 = vld [vmem:[%s2889_s0 + $0xa0] sm:$0xff]  ;;  %v1095_v56 = vand.u32 %v2445_v55, %v2872_v5  ;;  %vm1162_vm3 = vcmask 261120   ;;  %vm1164_vm4 = vcmask 254976   ;;  %vm1530_vm5 = vcmask 130048  }
  0x22   : > { %704 = vmatpush.bf16.msra.mxu2 %v695_v10  ;;  %2604 = vmatpush.bf16.msra.mxu3 %v695_v10  ;;  %v547_v15 = vld [vmem:[%s2889_s0] sm:$0xff]  ;;  %v569_v16 = vpack.c.bf16 %v2893_v14, %v2350_v13  ;;  %v2898_v17 = vld [vmem:[%s2889_s0 + $0x10] sm:$0xff]  ;;  %vm1623_vm6 = vcmask 1042432   ;;  %vm1598_vm7 = vcmask 1043456   ;;  %vm1600_vm8 = vcmask 1044480  }
  0x23   : > { %v668_v18 = vld [vmem:[%s2889_s0 + $0x1] sm:$0xff]  ;;  %v2902_v19 = vld [vmem:[%s2889_s0 + $0x11] sm:$0xff]  ;;  %v555_v20 = vpack.c.bf16 %v2898_v17, %v547_v15  ;;  %vm1602_vm9 = vcmask 1045504   ;;  %vm1604_vm10 = vcmask 1046528   ;;  %vm1864_vm11 = vcmask 195584  }
  0x24   : > { %v676_v21 = vpack.c.bf16 %v2902_v19, %v668_v18  ;;  %v2907_v22 = vld [vmem:[%s2889_s0 + $0x61] sm:$0xff]  ;;  %v2910_v23 = vld [vmem:[%s2889_s0 + $0x71] sm:$0xff]  ;;  %2359 = vmatmul.msk.bf16.vlgmr.msra.gmra.mxu0 %vm575_vm2, %v569_v16 }
  0x25   : > { %838 = vmatpush.bf16.msrb.mxu0 %v829_v11  ;;  %v679_v24 = vpack.c.bf16 %v2910_v23, %v2907_v22  ;;  %2363 = vmatmul.msk.bf16.vlgmr.msra.gmra.mxu1 %vm575_vm2, %v555_v20  ;;  %v2919_v25 = vld [vmem:[%s2889_s0 + $0xb0] sm:$0xff]  ;;  %v2922_v26 = vld [vmem:[%s2889_s0 + $0xc0] sm:$0xff] }
  0x26   : > { %771 = vmatpush.bf16.msrb.mxu3 %v762_v12  ;;  %2368 = vmatmul.msk.bf16.vlgmr.msra.gmra.mxu2 %vm575_vm2, %v676_v21  ;;  %v549_v27 = vld [vmem:[%s2889_s0 + $0x20] sm:$0xff]  ;;  %v2926_v28 = vld [vmem:[%s2889_s0 + $0x30] sm:$0xff]  ;;  %v570_v33 = vpack.c.bf16 %v2922_v26, %v2919_v25  ;;  %v1010_v3 = vpack.c.bf16 %v2919_v25, %v2893_v14 }
  0x27   : > { %2371 = vmatmul.msk.bf16.vlgmr.msra.gmra.mxu3 %vm575_vm2, %v679_v24  ;;  %v2929_v29 = vld [vmem:[%s2889_s0 + $0x21] sm:$0xff]  ;;  %v2932_v30 = vld [vmem:[%s2889_s0 + $0x31] sm:$0xff]  ;;  %v556_v34 = vpack.c.bf16 %v2926_v28, %v549_v27  ;;  %904 = vmatpush.bf16.msrb.mxu1 %v895_v41  ;;  %v943_v1 = vpack.c.bf16 %v549_v27, %v2898_v17 }
  0x28   : > { %v2372_v31 = vld [vmem:[%s2889_s0 + $0x120] sm:$0xff]  ;;  %v2373_v32 = vld [vmem:[%s2889_s0 + $0x130] sm:$0xff]  ;;  %v677_v35 = vpack.c.bf16 %v2932_v30, %v2929_v29  ;;  %971 = vmatpush.bf16.msrb.mxu2 %v962_v42 }
  0x29   : > { %v743_v36 = vpack.c.bf16 %v2373_v32, %v2372_v31  ;;  %v2958_v43 = vld [vmem:[%s2889_s0 + $0xd0] sm:$0xff]  ;;  %v2961_v44 = vld [vmem:[%s2889_s0 + $0xe0] sm:$0xff]  ;;  %1104 = vmatpush.bf16.msra.mxu0 %v1095_v56 }
  0x2a   : > { %1038 = vmatpush.bf16.msra.mxu3 %v1029_v40  ;;  %v551_v45 = vld [vmem:[%s2889_s0 + $0x40] sm:$0xff]  ;;  %v552_v46 = vld [vmem:[%s2889_s0 + $0x50] sm:$0xff]  ;;  %v571_v51 = vpack.c.bf16 %v2961_v44, %v2958_v43  ;;  %v1011_v14 = vpack.c.bf16 %v2958_v43, %v2922_v26  ;;  %v1076_v43 = vpack.c.bf16 %v2929_v29, %v2902_v19 }
  0x2b   : > { %v2966_v47 = vld [vmem:[%s2889_s0 + $0x41] sm:$0xff]  ;;  %v2969_v48 = vld [vmem:[%s2889_s0 + $0x51] sm:$0xff]  ;;  %v557_v52 = vpack.c.bf16 %v552_v46, %v551_v45  ;;  %v944_v12 = vpack.c.bf16 %v551_v45, %v2926_v28 }
  0x2c   : > { %v2374_v49 = vld [vmem:[%s2889_s0 + $0x140] sm:$0xff]  ;;  %v2375_v50 = vld [vmem:[%s2889_s0 + $0x150] sm:$0xff]  ;;  %v678_v53 = vpack.c.bf16 %v2969_v48, %v2966_v47 }
  0x2d   : > { %v744_v54 = vpack.c.bf16 %v2375_v50, %v2374_v49  ;;  %v2986_v57 = vld [vmem:[%s2889_s0 + $0xf0] sm:$0xff]  ;;  %v2989_v58 = vld [vmem:[%s2889_s0 + $0x100] sm:$0xff] }
  0x2e   : > { %v553_v59 = vld [vmem:[%s2889_s0 + $0x60] sm:$0xff]  ;;  %v554_v60 = vld [vmem:[%s2889_s0 + $0x70] sm:$0xff]  ;;  %v572_v63 = vpack.c.bf16 %v2989_v58, %v2986_v57  ;;  %v1012_v41 = vpack.c.bf16 %v2986_v57, %v2961_v44  ;;  %v1078_v57 = vpack.c.bf16 %v2907_v22, %v2969_v48 }
  0x2f   : > { %v2376_v61 = vld [vmem:[%s2889_s0 + $0x160] sm:$0xff]  ;;  %v2377_v62 = vld [vmem:[%s2889_s0 + $0x170] sm:$0xff]  ;;  %v558_v0 = vpack.c.bf16 %v554_v60, %v553_v59  ;;  %v945_v24 = vpack.c.bf16 %v553_v59, %v552_v46 }
  0x30   : > { %v745_v2 = vpack.c.bf16 %v2377_v62, %v2376_v61  ;;  %v2385_v4 = vld [vmem:[%s2889_s0 + $0x1b0] sm:$0xff]  ;;  %v2386_v5 = vld [vmem:[%s2889_s0 + $0x1c0] sm:$0xff] }
  0x31   : > { %v2398_v6 = vld [vmem:[%s2889_s0 + $0x121] sm:$0xff]  ;;  %v2399_v7 = vld [vmem:[%s2889_s0 + $0x131] sm:$0xff]  ;;  %v810_v10 = vpack.c.bf16 %v2386_v5, %v2385_v4 }
  0x32   : > { %v2378_v8 = vld [vmem:[%s2889_s0 + $0x180] sm:$0xff]  ;;  %v2379_v9 = vld [vmem:[%s2889_s0 + $0x190] sm:$0xff]  ;;  %v876_v11 = vpack.c.bf16 %v2399_v7, %v2398_v6 }
  0x33   : > { %v746_v13 = vpack.c.bf16 %v2379_v9, %v2378_v8  ;;  %v2387_v15 = vld [vmem:[%s2889_s0 + $0x1d0] sm:$0xff]  ;;  %v2388_v16 = vld [vmem:[%s2889_s0 + $0x1e0] sm:$0xff] }
  0x34   : > { %2360 = vmatmul.msk.bf16.gmra.mxu0 %vm575_vm2, %v570_v33  ;;  %v2400_v17 = vld [vmem:[%s2889_s0 + $0x141] sm:$0xff]  ;;  %v2401_v18 = vld [vmem:[%s2889_s0 + $0x151] sm:$0xff]  ;;  %v811_v20 = vpack.c.bf16 %v2388_v16, %v2387_v15 }
  0x35   : > { %2364 = vmatmul.msk.bf16.gmra.mxu1 %vm575_vm2, %v556_v34  ;;  %v877_v21 = vpack.c.bf16 %v2401_v18, %v2400_v17  ;;  %v2389_v25 = vld [vmem:[%s2889_s0 + $0x1f0] sm:$0xff]  ;;  %v2390_v26 = vld [vmem:[%s2889_s0 + $0x200] sm:$0xff] }
  0x36   : > { %2369 = vmatmul.msk.bf16.gmra.mxu2 %vm575_vm2, %v677_v35  ;;  %v2402_v27 = vld [vmem:[%s2889_s0 + $0x161] sm:$0xff]  ;;  %v2403_v28 = vld [vmem:[%s2889_s0 + $0x171] sm:$0xff]  ;;  %v812_v32 = vpack.c.bf16 %v2390_v26, %v2389_v25 }
  0x37   : > { %2381 = vmatmul.msk.bf16.vlgmr.msrb.gmra.mxu3 %vm575_vm2, %v743_v36  ;;  %v2418_v31 = vld [vmem:[%s2889_s0 + $0x80] sm:$0xff]  ;;  %v878_v33 = vpack.c.bf16 %v2403_v28, %v2402_v27  ;;  %v2391_v35 = vld [vmem:[%s2889_s0 + $0x210] sm:$0xff] }
  0x38   : > { %v946_v34 = vpack.c.bf16 %v2418_v31, %v554_v60  ;;  %v2392_v36 = vld [vmem:[%s2889_s0 + $0x220] sm:$0xff]  ;;  %v2405_v38 = vld [vmem:[%s2889_s0 + $0x191] sm:$0xff] }
  0x39   : > { %v2404_v37 = vld [vmem:[%s2889_s0 + $0x181] sm:$0xff]  ;;  %v813_v39 = vpack.c.bf16 %v2392_v36, %v2391_v35  ;;  %v2431_v42 = vld [vmem:[%s2889_s0 + $0x110] sm:$0xff] }
  0x3a   : > { %v879_v40 = vpack.c.bf16 %v2405_v38, %v2404_v37  ;;  %v1013_v49 = vpack.c.bf16 %v2431_v42, %v2989_v58  ;;  %v2444_v61 = vld [vmem:[%s2889_s0 + $0x81] sm:$0xff]  ;;  %s2676_s0 = scalar_lea.hbm %s3663_s17, 2 }
  0x3b   : > { %v1079_v62 = vpack.c.bf16 %v2444_v61, %v2910_v23  ;;  %v2582_v42 = vld [vmem:[%s3651_s5] sm:$0xff] }
  0x44   : > { %2361 = vmatmul.msk.bf16.gmra.mxu0 %vm575_vm2, %v571_v51 }
  0x45   : > { %2365 = vmatmul.msk.bf16.gmra.mxu1 %vm575_vm2, %v557_v52  ;;  %v1077_v52 = vpack.c.bf16 %v2966_v47, %v2932_v30 }
  0x46   : > { %2370 = vmatmul.msk.bf16.gmra.mxu2 %vm575_vm2, %v678_v53 }
  0x47   : > { %2382 = vmatmul.msk.bf16.gmra.mxu3 %vm575_vm2, %v744_v54 }
  0x54   : > { %2362 = vmatmul.msk.bf16.gmra.mxu0 %vm575_vm2, %v572_v63 }
  0x55   : > { %2366 = vmatmul.msk.bf16.gmra.mxu1 %vm575_vm2, %v558_v0 }
  0x56   : > { %2420 = vmatmul.msk.bf16.vlgmr.msrb.gmra.mxu2 %vm575_vm2, %v943_v1 }
  0x57   : > { %2383 = vmatmul.msk.bf16.gmra.mxu3 %vm575_vm2, %v745_v2 }
  0x64   : > { %2394 = vmatmul.msk.bf16.vlgmr.msrb.gmra.mxu0 %vm575_vm2, %v810_v10 }
  0x65   : > { %2407 = vmatmul.msk.bf16.vlgmr.msrb.gmra.mxu1 %vm575_vm2, %v876_v11 }
  0x66   : > { %2421 = vmatmul.msk.bf16.gmra.mxu2 %vm575_vm2, %v944_v12  ;;  %v2583_v12 = vld [vmem:[%s3651_s5 + $0x8] sm:$0xff] }
  0x67   : > { %2384 = vmatmul.msk.bf16.gmra.mxu3 %vm575_vm2, %v746_v13  ;;  %1491 = vmatpush.bf16.msra.mxu1 %v2583_v12 }
  0x6b   : > { %1492 = vmatpush.bf16.msra.mxu1 %v2582_v42 }
  0x74   : > { %2395 = vmatmul.msk.bf16.gmra.mxu0 %vm575_vm2, %v811_v20 }
  0x75   : > { %2408 = vmatmul.msk.bf16.gmra.mxu1 %vm575_vm2, %v877_v21 }
  0x76   : > { %2422 = vmatmul.msk.bf16.gmra.mxu2 %vm575_vm2, %v945_v24  ;;  %v2721_v24 = vmov 0.0  }
  0x77   : > { %2433 = vmatmul.msk.bf16.vlgmr.msra.gmra.mxu3 %vm575_vm2, %v1010_v3  ;;  %1166 = vst.msk [vmem:[#allocation2 + $0x10] sm:$0xff] %vm1162_vm3, %v2721_v24 }
  0x78   : > { %1167 = vst.msk [vmem:[#allocation2 + $0x18] sm:$0x3] %vm1164_vm4, %v2721_v24 }
  0x79   : > { %1163 = vst.msk [vmem:[#allocation2] sm:$0xff] %vm1162_vm3, %v2721_v24 }
  0x7a   : > { %1165 = vst.msk [vmem:[#allocation2 + $0x8] sm:$0x3] %vm1164_vm4, %v2721_v24 }
  0x7b   : > { %1168 = vst.msk [vmem:[#allocation2 + $0x20] sm:$0xff] %vm1162_vm3, %v2721_v24 }
  0x7c   : > { %1169 = vst.msk [vmem:[#allocation2 + $0x28] sm:$0x3] %vm1164_vm4, %v2721_v24 }
  0x7d   : > { %1170 = vst.msk [vmem:[#allocation2 + $0x30] sm:$0xff] %vm1162_vm3, %v2721_v24 }
  0x7e   : > { %1171 = vst.msk [vmem:[#allocation2 + $0x38] sm:$0x3] %vm1164_vm4, %v2721_v24 }
  0x7f   : > { %1172 = vst.msk [vmem:[#allocation2 + $0x40] sm:$0xff] %vm1162_vm3, %v2721_v24 }
  0x80   : > { %1173 = vst.msk [vmem:[#allocation2 + $0x48] sm:$0x3] %vm1164_vm4, %v2721_v24 }
  0x81   : > { %1174 = vst.msk [vmem:[#allocation2 + $0x50] sm:$0xff] %vm1162_vm3, %v2721_v24  ;;  %v1220_v12 = vld [vmem:[#allocation2 + $0x1] sm:$0xff] }
  0x82   : > { %1175 = vst.msk [vmem:[#allocation2 + $0x58] sm:$0x3] %vm1164_vm4, %v2721_v24 }
  0x83   : > { %1176 = vst.msk [vmem:[#allocation2 + $0x60] sm:$0xff] %vm1162_vm3, %v2721_v24 }
  0x84   : > { %2396 = vmatmul.msk.bf16.gmra.mxu0 %vm575_vm2, %v812_v32  ;;  %1177 = vst.msk [vmem:[#allocation2 + $0x68] sm:$0x3] %vm1164_vm4, %v2721_v24 }
  0x85   : > { %2409 = vmatmul.msk.bf16.gmra.mxu1 %vm575_vm2, %v878_v33  ;;  %1178 = vst.msk [vmem:[#allocation2 + $0x70] sm:$0xff] %vm1162_vm3, %v2721_v24 }
  0x86   : > { %2423 = vmatmul.msk.bf16.gmra.mxu2 %vm575_vm2, %v946_v34  ;;  %1179 = vst.msk [vmem:[#allocation2 + $0x78] sm:$0x3] %vm1164_vm4, %v2721_v24 }
  0x87   : > { %2434 = vmatmul.msk.bf16.gmra.mxu3 %vm575_vm2, %v1011_v14  ;;  %1180 = vst.msk [vmem:[#allocation2 + $0x80] sm:$0xff] %vm1162_vm3, %v2721_v24 }
  0x88   : > { %1181 = vst.msk [vmem:[#allocation2 + $0x88] sm:$0x3] %vm1164_vm4, %v2721_v24 }
  0x89   : > { %1182 = vst.msk [vmem:[#allocation2 + $0x90] sm:$0xff] %vm1162_vm3, %v2721_v24 }
  0x8a   : > { %1183 = vst.msk [vmem:[#allocation2 + $0x98] sm:$0x3] %vm1164_vm4, %v2721_v24 }
  0x94   : > { %2397 = vmatmul.msk.bf16.gmra.mxu0 %vm575_vm2, %v813_v39 }
  0x95   : > { %2410 = vmatmul.msk.bf16.gmra.mxu1 %vm575_vm2, %v879_v40 }
  0x97   : > { %2435 = vmatmul.msk.bf16.gmra.mxu3 %vm575_vm2, %v1012_v41 }
  0xa1   : > { %v3046_v45 = vpop.f32.mrf.mxu0 }
  0xa2   : > { %v3048_v46 = vpop.f32.mrf.mxu1 }
  0xa3   : > { %v649_v28 = vadd.f32 %v3048_v46, %v3046_v45 }
  0xa4   : > { %2446 = vmatmul.msk.bf16.vlgmr.msra.gmra.mxu0 %vm575_vm2, %v1076_v43 }
  0xa7   : > { %2436 = vmatmul.msk.bf16.gmra.mxu3 %vm575_vm2, %v1013_v49 }
  0xa9   : > { %v3053_v44 = vpop.f32.mrf.mxu0  ;;  %v706_v63 = vpop.f32.mrf.mxu2 }
  0xaa   : > { %v721_v50 = vpop.f32.mrf.mxu3  ;;  %v3055_v51 = vpop.f32.mrf.mxu1  ;;  %v726_v32 = vadd.f32 %v706_v63, %v649_v28  ;;  %v3166_v63 = vld [vmem:[%s3683_s3] sm:$0xff] }
  0xab   : > { %v651_v37 = vadd.f32 %v3055_v51, %v3053_v44 }
  0xb1   : > { %v3059_v19 = vpop.f32.mrf.mxu0  ;;  %v708_v4 = vpop.f32.mrf.mxu2 }
  0xb2   : > { %v3061_v29 = vpop.f32.mrf.mxu1  ;;  %v3063_v53 = vpop.f32.mrf.mxu3  ;;  %v727_v40 = vadd.f32 %v708_v4, %v651_v37 }
  0xb3   : > { %v654_v44 = vadd.f32 %v3061_v29, %v3059_v19 }
  0xb4   : > { %2447 = vmatmul.msk.bf16.gmra.mxu0 %vm575_vm2, %v1077_v52  ;;  %v3160_v52 = vld [vmem:[%s3682_s2] ss:$0 sm:$0xff]  ;;  %s540_s2 = scalar_lea.vmem [#allocation3], %s539_s29 }
  0xb5   : > { %s2288_s22 = sshll.u32 %s540_s2, 4  ;;  %s2289_s22 = int_to_ptr.vmem [resolvable:$true] %s2288_s22 }
  0xb9   : > { %v3066_v54 = vpop.f32.mrf.mxu0  ;;  %v3094_v7 = vpop.f32.mrf.mxu2 }
  0xba   : > { %v3068_v55 = vpop.f32.mrf.mxu1  ;;  %v773_v56 = vpop.f32.mrf.mxu3 }
  0xbb   : > { %v793_v34 = vadd.f32 %v773_v56, %v726_v32  ;;  %v3182_v32 = vperm.slane %v3166_v63, 2 }
  0xc1   : > { %v3072_v58 = vpop.f32.mrf.mxu0  ;;  %v3098_v9 = vpop.f32.mrf.mxu2 }
  0xc2   : > { %v3074_v59 = vpop.f32.mrf.mxu1  ;;  %v3077_v30 = vpop.f32.mrf.mxu3 }
  0xc3   : > { %v794_v43 = vadd.f32 %v3077_v30, %v727_v40 }
  0xc4   : > { %2448 = vmatmul.msk.bf16.gmra.mxu0 %vm575_vm2, %v1078_v57  ;;  %v728_v57 = vadd.f32 %v3094_v7, %v654_v44 }
  0xc9   : > { %v3079_v47 = vpop.f32.mrf.mxu0  ;;  %v3109_v14 = vpop.f32.mrf.mxu2 }
  0xca   : > { %v3081_v60 = vpop.f32.mrf.mxu1  ;;  %v3085_v1 = vpop.f32.mrf.mxu3 }
  0xcb   : > { %v795_v19 = vadd.f32 %v3085_v1, %v728_v57 }
  0xd1   : > { %v619_v0 = vpop.f32.mrf.mxu0  ;;  %v3117_v18 = vpop.f32.mrf.mxu2 }
  0xd2   : > { %v663_v22 = vpop.f32.mrf.mxu1  ;;  %v3092_v5 = vpop.f32.mrf.mxu3 }
  0xd3   : > { %v664_v48 = vadd.f32 %v663_v22, %v619_v0  ;;  %v3171_v0 = vperm.slane %v3166_v63, 0  ;;  %v3174_v22 = vperm.slane %v3166_v63, 1 }
  0xd4   : > { %2449 = vmatmul.msk.bf16.gmra.mxu0 %vm575_vm2, %v1079_v62 }
  0xd5   : > { %v3088_v2 = vadd.f32 %v721_v50, %v664_v48  ;;  %v1229_v28 = vmul.f32 %v3174_v22, %v1220_v12 }
  0xd9   : > { %v3090_v3 = vpop.f32.mrf.mxu0  ;;  %v973_v26 = vpop.f32.mrf.mxu2 }
  0xda   : > { %v3096_v8 = vpop.f32.mrf.mxu3  ;;  %v3113_v16 = vpop.f32.mrf.mxu1 }
  0xe1   : > { %v840_v6 = vpop.f32.mrf.mxu0  ;;  %v975_v36 = vpop.f32.mrf.mxu2 }
  0xe2   : > { %v3100_v10 = vpop.f32.mrf.mxu3  ;;  %v906_v21 = vpop.f32.mrf.mxu1  ;;  %v860_v35 = vadd.f32 %v840_v6, %v793_v34 }
  0xe4   : > { %v926_v41 = vadd.f32 %v906_v21, %v860_v35  ;;  %v656_v21 = vadd.f32 %v3068_v55, %v3066_v54 }
  0xe6   : > { %v993_v46 = vadd.f32 %v973_v26, %v926_v41 }
  0xe9   : > { %v842_v23 = vpop.f32.mrf.mxu0  ;;  %v978_v50 = vpop.f32.mrf.mxu2 }
  0xea   : > { %v3111_v15 = vpop.f32.mrf.mxu3  ;;  %v908_v33 = vpop.f32.mrf.mxu1  ;;  %v861_v49 = vadd.f32 %v842_v23, %v794_v43  ;;  %v1195_v23 = vld [vmem:[#allocation2] sm:$0xff] }
  0xec   : > { %v927_v61 = vadd.f32 %v908_v33, %v861_v49  ;;  %v729_v33 = vadd.f32 %v3098_v9, %v656_v21  ;;  %v659_v9 = vadd.f32 %v3074_v59, %v3072_v58 }
  0xee   : > { %v994_v48 = vadd.f32 %v975_v36, %v927_v61  ;;  %v1245_v36 = vld [vmem:[#allocation2 + $0x2] sm:$0xff]  ;;  %v796_v54 = vadd.f32 %v3092_v5, %v729_v33  ;;  %v730_v5 = vadd.f32 %v3109_v14, %v659_v9 }
  0xef   : > { %v1254_v40 = vmul.f32 %v3182_v32, %v1245_v36 }
  0xf1   : > { %v3102_v11 = vpop.f32.mrf.mxu0  ;;  %v980_v34 = vpop.f32.mrf.mxu2 }
  0xf2   : > { %v3119_v20 = vpop.f32.mrf.mxu3  ;;  %v911_v45 = vpop.f32.mrf.mxu1  ;;  %v862_v4 = vadd.f32 %v3102_v11, %v795_v19  ;;  %v797_v19 = vadd.f32 %v3096_v8, %v730_v5 }
  0xf4   : > { %v928_v11 = vadd.f32 %v911_v45, %v862_v4  ;;  %v3193_v45 = vperm.slane %v3166_v63, 3 }
  0xf6   : > { %v995_v41 = vadd.f32 %v978_v50, %v928_v11  ;;  %v3197_v50 = vperm.slane %v3166_v63, 4 }
  0xf9   : > { %v3107_v13 = vpop.f32.mrf.mxu0  ;;  %v983_v14 = vpop.f32.mrf.mxu2 }
  0xfa   : > { %v1040_v27 = vpop.f32.mrf.mxu3  ;;  %v913_v6 = vpop.f32.mrf.mxu1  ;;  %v863_v42 = vadd.f32 %v3107_v13, %v796_v54 }
  0xfb   : > { %v1060_v51 = vadd.f32 %v1040_v27, %v993_v46  ;;  %v1204_v27 = vmul.f32 %v3171_v0, %v1195_v23 }
  0xfc   : > { %v929_v13 = vadd.f32 %v913_v6, %v863_v42  ;;  %v3207_v6 = vperm.slane %v3166_v63, 5 }
  0xfe   : > { %v996_v23 = vadd.f32 %v980_v34, %v929_v13 }
 0x101   : > { %v3115_v17 = vpop.f32.mrf.mxu0 }
 0x102   : > { %v1042_v38 = vpop.f32.mrf.mxu3  ;;  %v916_v46 = vpop.f32.mrf.mxu1  ;;  %v864_v12 = vadd.f32 %v3115_v17, %v797_v19 }
 0x103   : > { %v1061_v24 = vadd.f32 %v1042_v38, %v994_v48  ;;  %v1237_v38 = vadd.f32 %v1229_v28, %v1204_v27  ;;  %v3213_v27 = vperm.slane %v3166_v63, 6 }
 0x105   : > { %v1262_v61 = vadd.f32 %v1254_v40, %v1237_v38  ;;  %v930_v38 = vadd.f32 %v916_v46, %v864_v12 }
 0x109   : > { %v3122_v25 = vpop.f32.mrf.mxu0 }
 0x10a   : > { %v1045_v62 = vpop.f32.mrf.mxu3 }
 0x10b   : > { %v1062_v49 = vadd.f32 %v1045_v62, %v995_v41 }
 0x111   : > { %v3134_v31 = vpop.f32.mrf.mxu0 }
 0x112   : > { %v1047_v55 = vpop.f32.mrf.mxu3 }
 0x113   : > { %v1063_v28 = vadd.f32 %v1047_v55, %v996_v23 }
 0x119   : > { %v3146_v39 = vpop.f32.mrf.mxu0 }
 0x11a   : > { %v1050_v21 = vpop.f32.mrf.mxu3 }
 0x121   : > { %v1106_v56 = vpop.f32.mrf.mxu0 }
 0x122   : > { %v1126_v30 = vadd.f32 %v1106_v56, %v1060_v51 }
 0x124   : > { %v1138_v29 = vadd.f32 %v3160_v52, %v1126_v30 }
 0x126   : > { %v1146_v7 = vmax.f32 %v1138_v29, 0.0 }
 0x128   : > { %v1154_v1 = vmin.f32 %v1146_v7, 6.0 }
 0x129   : > { %v1108_v26 = vpop.f32.mrf.mxu0 }
 0x12a   : > { %1185 = vst.msk [vmem:[#allocation2 + $0x11] sm:$0xff] %vm1162_vm3, %v1154_v1  ;;  %v1127_v35 = vadd.f32 %v1108_v26, %v1061_v24  ;;  %v661_v26 = vadd.f32 %v3081_v60, %v3079_v47  ;;  %v918_v47 = vpop.f32.mrf.mxu1 }
 0x12c   : > { %v1139_v37 = vadd.f32 %v3160_v52, %v1127_v35  ;;  %v731_v35 = vadd.f32 %v3117_v18, %v661_v26 }
 0x12e   : > { %v1147_v43 = vmax.f32 %v1139_v37, 0.0  ;;  %v3219_v37 = vperm.slane %v3166_v63, 7  ;;  %v798_v41 = vadd.f32 %v3100_v10, %v731_v35 }
 0x130   : > { %v1155_v44 = vmin.f32 %v1147_v43, 6.0  ;;  %v3228_v43 = vld [vmem:[%s3683_s3 + $0x8] ss:$0 sm:$0xff]  ;;  %v865_v10 = vadd.f32 %v3122_v25, %v798_v41  ;;  %s2670_s3 = sshra.s32 %s2291_s19, 4  ;;  %s2671_s3 = int_to_ptr.hbm [resolvable:$true] %s2670_s3 }
 0x131   : > { %v1111_v51 = vpop.f32.mrf.mxu0  ;;  %v1196_v56 = vld [vmem:[#allocation2 + $0x10] sm:$0xff]  ;;  %p2677_p0 = scmp.lt.s32.totalorder %s2671_s3, %s3663_s17 }
 0x132   : > { %v1221_v57 = vld [vmem:[#allocation2 + $0x11] sm:$0xff]  ;;  %1186 = vst.msk [vmem:[#allocation2 + $0x21] sm:$0xff] %vm1162_vm3, %v1155_v44  ;;  %v1128_v30 = vadd.f32 %v1111_v51, %v1062_v49  ;;  %v1205_v58 = vmul.f32 %v3171_v0, %v1196_v56  ;;  %v1279_v62 = vmul.f32 %v3193_v45, %v1196_v56  ;;  %v931_v25 = vadd.f32 %v918_v47, %v865_v10 }
 0x133   : > { %v1230_v59 = vmul.f32 %v3174_v22, %v1221_v57  ;;  %v1246_v48 = vld [vmem:[#allocation2 + $0x12] sm:$0xff]  ;;  %v1304_v7 = vmul.f32 %v3197_v50, %v1221_v57  ;;  %v997_v57 = vadd.f32 %v983_v14, %v930_v38 }
 0x134   : > { %v1140_v29 = vadd.f32 %v3160_v52, %v1128_v30  ;;  %v1287_v4 = vadd.f32 %v1279_v62, %v1262_v61  ;;  %v1255_v11 = vmul.f32 %v3182_v32, %v1246_v48  ;;  %v1329_v17 = vmul.f32 %v3207_v6, %v1246_v48  ;;  %v985_v61 = vpop.f32.mrf.mxu2 }
 0x135   : > { %v1238_v1 = vadd.f32 %v1230_v59, %v1205_v58  ;;  %v1064_v19 = vadd.f32 %v1050_v21, %v997_v57  ;;  %v666_v21 = vadd.f32 %v3113_v16, %v3090_v3  ;;  %v998_v38 = vadd.f32 %v985_v61, %v931_v25 }
 0x136   : > { %v1148_v24 = vmax.f32 %v1140_v29, 0.0  ;;  %v1312_v8 = vadd.f32 %v1304_v7, %v1287_v4  ;;  %v1052_v29 = vpop.f32.mrf.mxu3  ;;  %v799_v7 = vadd.f32 %v3111_v15, %v3088_v2 }
 0x137   : > { %v1263_v40 = vadd.f32 %v1255_v11, %v1238_v1  ;;  %v3243_v1 = vld [vmem:[%s3684_s4] ss:$0 sm:$0xff]  ;;  %s2672_s4 = scalar_lea.hbm %s2671_s3, 1 }
 0x138   : > { %v1156_v33 = vmin.f32 %v1148_v24, 6.0  ;;  %v1337_v42 = vadd.f32 %v1329_v17, %v1312_v8  ;;  %p2673_p11 = scmp.ne.s32.totalorder %s2671_s3, %s2672_s4  ;;  %p2678_p1 = scmp.lt.s32.totalorder %s2676_s0, %s2672_s4 }
 0x139   : > { %v1113_v36 = vpop.f32.mrf.mxu0  ;;  %v1271_v34 = vld [vmem:[#allocation2 + $0x20] sm:$0xff] }
 0x13a   : > { %v1296_v54 = vld [vmem:[#allocation2 + $0x21] sm:$0xff]  ;;  %1187 = vst.msk [vmem:[#allocation2 + $0x31] sm:$0xff] %vm1162_vm3, %v1156_v33  ;;  %v1129_v60 = vadd.f32 %v1113_v36, %v1063_v28  ;;  %v1280_v55 = vmul.f32 %v3193_v45, %v1271_v34  ;;  %v1355_v18 = vmul.f32 %v3213_v27, %v1271_v34  ;;  %v1206_v63 = vmul.f32 %v1271_v34, %v3171_v0  ;;  %v921_v34 = vpop.f32.mrf.mxu1  ;;  %p2674_p12 = pnand %p2673_p11, %p2850_p5  ;;  %p2679_p2 = por %p2678_p1, %p2677_p0 }
 0x13b   : > { %v1305_v49 = vmul.f32 %v3197_v50, %v1296_v54  ;;  %v1321_v44 = vld [vmem:[#allocation2 + $0x22] sm:$0xff]  ;;  %v1231_v5 = vmul.f32 %v1296_v54, %v3174_v22  ;;  %v1380_v56 = vmul.f32 %v3219_v37, %v1296_v54  ;;  %v866_v33 = vadd.f32 %v3134_v31, %v799_v7 }
 0x13c   : > { %v1141_v9 = vadd.f32 %v3160_v52, %v1129_v60  ;;  %v1288_v46 = vadd.f32 %v1280_v55, %v1263_v40  ;;  %v1363_v51 = vadd.f32 %v1355_v18, %v1337_v42  ;;  %v1405_v59 = vmul.f32 %v3228_v43, %v1321_v44  ;;  %p2675_p13 = pneg %p2674_p12 }
 0x13d   : > { %v1239_v62 = vadd.f32 %v1231_v5, %v1206_v63  ;;  %v1330_v4 = vmul.f32 %v3207_v6, %v1321_v44  ;;  %v1256_v26 = vmul.f32 %v1321_v44, %v3182_v32  ;;  %v733_v18 = vadd.f32 %v3063_v53, %v666_v21 }
 0x13e   : > { %v1149_v13 = vmax.f32 %v1141_v9, 0.0  ;;  %v1313_v30 = vadd.f32 %v1305_v49, %v1288_v46  ;;  %v1388_v58 = vadd.f32 %v1380_v56, %v1363_v51  ;;  %v932_v63 = vadd.f32 %v921_v34, %v866_v33  ;;  %v988_v46 = vpop.f32.mrf.mxu2  ;;  %p2680_p3 = pnand %p2679_p2, %p2675_p13 }
 0x13f   : > { %v1264_v36 = vadd.f32 %v1256_v26, %v1239_v62  ;;  %v1065_v9 = vadd.f32 %v1052_v29, %v998_v38  ;;  %v800_v51 = vadd.f32 %v3119_v20, %v733_v18 }
 0x140   : > { %v1157_v48 = vmin.f32 %v1149_v13, 6.0  ;;  %v1413_v14 = vadd.f32 %v1405_v59, %v1388_v58  ;;  %v1338_v28 = vadd.f32 %v1330_v4, %v1313_v30  ;;  %v1055_v58 = vpop.f32.mrf.mxu3  ;;  %v999_v29 = vadd.f32 %v988_v46, %v932_v63 }
 0x141   : > { %v1116_v23 = vpop.f32.mrf.mxu0  ;;  %v1347_v12 = vld [vmem:[#allocation2 + $0x30] sm:$0xff] }
 0x142   : > { %v1372_v24 = vld [vmem:[#allocation2 + $0x31] sm:$0xff]  ;;  %1188 = vst.msk [vmem:[#allocation2 + $0x41] sm:$0xff] %vm1162_vm3, %v1157_v48  ;;  %v1130_v8 = vadd.f32 %v1116_v23, %v1064_v19  ;;  %v1356_v2 = vmul.f32 %v3213_v27, %v1347_v12  ;;  %v1207_v11 = vmul.f32 %v1347_v12, %v3171_v0  ;;  %v1281_v16 = vmul.f32 %v1347_v12, %v3193_v45 }
 0x143   : > { %v1397_v15 = vld [vmem:[#allocation2 + $0x32] sm:$0xff]  ;;  %v1232_v35 = vmul.f32 %v1372_v24, %v3174_v22  ;;  %v1381_v3 = vmul.f32 %v3219_v37, %v1372_v24  ;;  %v1425_v60 = vadd.f32 %v3243_v1, %v1413_v14  ;;  %v1306_v31 = vmul.f32 %v1372_v24, %v3197_v50 }
 0x144   : > { %v1142_v54 = vadd.f32 %v3160_v52, %v1130_v8  ;;  %v1364_v17 = vadd.f32 %v1356_v2, %v1338_v28  ;;  %v1406_v47 = vmul.f32 %v3228_v43, %v1397_v15  ;;  %v1289_v42 = vadd.f32 %v1281_v16, %v1264_v36  ;;  %v923_v28 = vpop.f32.mrf.mxu1 }
 0x145   : > { %v1240_v41 = vadd.f32 %v1232_v35, %v1207_v11  ;;  %v1257_v5 = vmul.f32 %v1397_v15, %v3182_v32  ;;  %v1433_v57 = vmax.f32 %v1425_v60, 0.0  ;;  %v1331_v30 = vmul.f32 %v1397_v15, %v3207_v6 }
 0x146   : > { %v1150_v40 = vmax.f32 %v1142_v54, 0.0  ;;  %v1389_v55 = vadd.f32 %v1381_v3, %v1364_v17  ;;  %v1314_v10 = vadd.f32 %v1306_v31, %v1289_v42  ;;  %v867_v48 = vadd.f32 %v3146_v39, %v800_v51 }
 0x147   : > { %v1265_v62 = vadd.f32 %v1257_v5, %v1240_v41  ;;  %v1441_v39 = vmin.f32 %v1433_v57, 6.0  ;;  %v1066_v34 = vadd.f32 %v1055_v58, %v999_v29 }
 0x148   : > { %v1158_v49 = vmin.f32 %v1150_v40, 6.0  ;;  %v1414_v44 = vadd.f32 %v1406_v47, %v1389_v55  ;;  %v1339_v4 = vadd.f32 %v1331_v30, %v1314_v10  ;;  %v933_v16 = vadd.f32 %v923_v28, %v867_v48  ;;  %v990_v55 = vpop.f32.mrf.mxu2 }
 0x149   : > { %v1118_v56 = vpop.f32.mrf.mxu0  ;;  %v1273_v61 = vld [vmem:[#allocation2 + $0x40] sm:$0xff] }
 0x14a   : > { %v1298_v13 = vld [vmem:[#allocation2 + $0x41] sm:$0xff]  ;;  %1189 = vst.msk [vmem:[#allocation2 + $0x51] sm:$0xff] %vm1162_vm3, %v1158_v49  ;;  %v1131_v53 = vadd.f32 %v1118_v56, %v1065_v9  ;;  %v1426_v59 = vadd.f32 %v3243_v1, %v1414_v44  ;;  %v1282_v19 = vmul.f32 %v3193_v45, %v1273_v61  ;;  %v1357_v20 = vmul.f32 %v3213_v27, %v1273_v61  ;;  %v1057_v44 = vpop.f32.mrf.mxu3 }
 0x14b   : > { %v1307_v12 = vmul.f32 %v3197_v50, %v1298_v13  ;;  %v1323_v24 = vld [vmem:[#allocation2 + $0x42] sm:$0xff]  ;;  %v1382_v26 = vmul.f32 %v3219_v37, %v1298_v13  ;;  %v1208_v21 = vmul.f32 %v1273_v61, %v3171_v0  ;;  %v1233_v8 = vmul.f32 %v1298_v13, %v3174_v22 }
 0x14c   : > { %v1143_v7 = vadd.f32 %v3160_v52, %v1131_v53  ;;  %v1434_v25 = vmax.f32 %v1426_v59, 0.0  ;;  %v1290_v23 = vadd.f32 %v1282_v19, %v1265_v62  ;;  %v1365_v14 = vadd.f32 %v1357_v20, %v1339_v4 }
 0x14d   : > { %v1407_v35 = vmul.f32 %v3228_v43, %v1323_v24  ;;  %v1241_v36 = vadd.f32 %v1233_v8, %v1208_v21  ;;  %v1332_v3 = vmul.f32 %v3207_v6, %v1323_v24  ;;  %v1258_v40 = vmul.f32 %v1323_v24, %v3182_v32 }
 0x14e   : > { %v1151_v2 = vmax.f32 %v1143_v7, 0.0  ;;  %v1442_v15 = vmin.f32 %v1434_v25, 6.0  ;;  %v1315_v33 = vadd.f32 %v1307_v12, %v1290_v23  ;;  %v1390_v11 = vadd.f32 %v1382_v26, %v1365_v14 }
 0x14f   : > { %v1266_v49 = vadd.f32 %v1258_v40, %v1241_v36  ;;  %v1000_v57 = vadd.f32 %v990_v55, %v933_v16 }
 0x150   : > { %v1159_v54 = vmin.f32 %v1151_v2, 6.0  ;;  %v1449_v17 = vpack.c.bf16 %v1442_v15, %v1441_v39  ;;  %v1415_v31 = vadd.f32 %v1407_v35, %v1390_v11  ;;  %v1340_v42 = vadd.f32 %v1332_v3, %v1315_v33 }
 0x151   : > { %v1121_v38 = vpop.f32.mrf.mxu0  ;;  %v1349_v47 = vld [vmem:[#allocation2 + $0x50] sm:$0xff]  ;;  %v1067_v19 = vadd.f32 %v1057_v44, %v1000_v57 }
 0x152   : > { %v1374_v60 = vld [vmem:[#allocation2 + $0x51] sm:$0xff]  ;;  %1190 = vst.msk [vmem:[#allocation2 + $0x61] sm:$0xff] %vm1162_vm3, %v1159_v54  ;;  %v1132_v41 = vadd.f32 %v1121_v38, %v1066_v34  ;;  %2458 = vmatmul.msk.bf16.vlgmr.msra.gmra.mxu1 %vm1162_vm3, %v1449_v17  ;;  %v1358_v18 = vmul.f32 %v3213_v27, %v1349_v47  ;;  %v1209_v9 = vmul.f32 %v1349_v47, %v3171_v0 }
 0x153   : > { %v1399_v63 = vld [vmem:[#allocation2 + $0x52] sm:$0xff]  ;;  %v1234_v46 = vmul.f32 %v1374_v60, %v3174_v22  ;;  %v1383_v51 = vmul.f32 %v3219_v37, %v1374_v60  ;;  %v1283_v56 = vmul.f32 %v1349_v47, %v3193_v45  ;;  %v1427_v13 = vadd.f32 %v3243_v1, %v1415_v31 }
 0x154   : > { %v1144_v5 = vadd.f32 %v3160_v52, %v1132_v41  ;;  %v1366_v10 = vadd.f32 %v1358_v18, %v1340_v42  ;;  %v1408_v61 = vmul.f32 %v3228_v43, %v1399_v63  ;;  %v1308_v62 = vmul.f32 %v1374_v60, %v3197_v50 }
 0x155   : > { %v1242_v30 = vadd.f32 %v1234_v46, %v1209_v9  ;;  %v1291_v59 = vadd.f32 %v1283_v56, %v1266_v49  ;;  %v1259_v4 = vmul.f32 %v1399_v63, %v3182_v32  ;;  %v1435_v25 = vmax.f32 %v1427_v13, 0.0 }
 0x156   : > { %v1152_v58 = vmax.f32 %v1144_v5, 0.0  ;;  %v1391_v53 = vadd.f32 %v1383_v51, %v1366_v10  ;;  %v1333_v24 = vmul.f32 %v1399_v63, %v3207_v6  ;;  %v2584_v5 = vld [vmem:[%s3653_s7] sm:$0xff] }
 0x157   : > { %v1316_v20 = vadd.f32 %v1308_v62, %v1291_v59  ;;  %v1267_v21 = vadd.f32 %v1259_v4, %v1242_v30  ;;  %v1443_v16 = vmin.f32 %v1435_v25, 6.0  ;;  %1550 = vmatpush.bf16.msra.mxu2 %v2584_v5 }
 0x158   : > { %v1160_v29 = vmin.f32 %v1152_v58, 6.0  ;;  %v1416_v48 = vadd.f32 %v1408_v61, %v1391_v53 }
 0x159   : > { %v1123_v7 = vpop.f32.mrf.mxu0  ;;  %v1275_v23 = vld [vmem:[#allocation2 + $0x60] sm:$0xff]  ;;  %v1341_v28 = vadd.f32 %v1333_v24, %v1316_v20  ;;  %v1353_v24 = vld [vmem:[#allocation2 + $0x90] sm:$0xff] }
 0x15a   : > { %v1300_v12 = vld [vmem:[#allocation2 + $0x61] sm:$0xff]  ;;  %1191 = vst.msk [vmem:[#allocation2 + $0x71] sm:$0xff] %vm1162_vm3, %v1160_v29  ;;  %v1133_v14 = vadd.f32 %v1123_v7, %v1067_v19  ;;  %v1428_v26 = vadd.f32 %v3243_v1, %v1416_v48  ;;  %v1284_v8 = vmul.f32 %v3193_v45, %v1275_v23  ;;  %v1359_v2 = vmul.f32 %v3213_v27, %v1275_v23 }
 0x15b   : > { %v1309_v11 = vmul.f32 %v3197_v50, %v1300_v12  ;;  %v1325_v35 = vld [vmem:[#allocation2 + $0x62] sm:$0xff]  ;;  %v1384_v34 = vmul.f32 %v3219_v37, %v1300_v12  ;;  %v1210_v54 = vmul.f32 %v1275_v23, %v3171_v0  ;;  %v1235_v17 = vmul.f32 %v1300_v12, %v3174_v22 }
 0x15c   : > { %v1145_v39 = vadd.f32 %v3160_v52, %v1133_v14  ;;  %v1436_v15 = vmax.f32 %v1428_v26, 0.0  ;;  %v1292_v33 = vadd.f32 %v1284_v8, %v1267_v21  ;;  %v1367_v36 = vadd.f32 %v1359_v2, %v1341_v28 }
 0x15d   : > { %v1409_v31 = vmul.f32 %v3228_v43, %v1325_v35  ;;  %v1334_v55 = vmul.f32 %v3207_v6, %v1325_v35  ;;  %v1243_v41 = vadd.f32 %v1235_v17, %v1210_v54  ;;  %v1260_v44 = vmul.f32 %v1325_v35, %v3182_v32  ;;  %v1403_v54 = vld [vmem:[#allocation2 + $0x92] sm:$0xff] }
 0x15e   : > { %v1153_v3 = vmax.f32 %v1145_v39, 0.0  ;;  %v1444_v38 = vmin.f32 %v1436_v15, 6.0  ;;  %v1317_v47 = vadd.f32 %v1309_v11, %v1292_v33  ;;  %v1392_v60 = vadd.f32 %v1384_v34, %v1367_v36  ;;  %v1378_v15 = vld [vmem:[#allocation2 + $0x91] sm:$0xff] }
 0x15f   : > { %v1268_v61 = vadd.f32 %v1260_v44, %v1243_v41  ;;  %v1362_v2 = vmul.f32 %v3213_v27, %v1353_v24 }
 0x160   : > { %v1161_v52 = vmin.f32 %v1153_v3, 6.0  ;;  %v1450_v40 = vpack.c.bf16 %v1444_v38, %v1443_v16  ;;  %v1417_v63 = vadd.f32 %v1409_v31, %v1392_v60  ;;  %v1342_v9 = vadd.f32 %v1334_v55, %v1317_v47 }
 0x161   : > { %v1351_v42 = vld [vmem:[#allocation2 + $0x70] sm:$0xff]  ;;  %v1387_v16 = vmul.f32 %v3219_v37, %v1378_v15 }
 0x162   : > { %v1376_v18 = vld [vmem:[#allocation2 + $0x71] sm:$0xff]  ;;  %1192 = vst.msk [vmem:[#allocation2 + $0x81] sm:$0xff] %vm1162_vm3, %v1161_v52  ;;  %2459 = vmatmul.msk.bf16.gmra.mxu1 %vm1162_vm3, %v1450_v40  ;;  %v1360_v46 = vmul.f32 %v3213_v27, %v1351_v42  ;;  %v1211_v10 = vmul.f32 %v1351_v42, %v3171_v0  ;;  %v1285_v13 = vmul.f32 %v1351_v42, %v3193_v45 }
 0x163   : > { %v1401_v49 = vld [vmem:[#allocation2 + $0x72] sm:$0xff]  ;;  %v1236_v51 = vmul.f32 %v1376_v18, %v3174_v22  ;;  %v1385_v57 = vmul.f32 %v3219_v37, %v1376_v18  ;;  %v1429_v58 = vadd.f32 %v3243_v1, %v1417_v63  ;;  %v1310_v19 = vmul.f32 %v1376_v18, %v3197_v50  ;;  %v2650_v63 = vld [vmem:[%s3652_s6] ss:$0 sm:$0xff] }
 0x164   : > { %v1368_v56 = vadd.f32 %v1360_v46, %v1342_v9  ;;  %v1410_v30 = vmul.f32 %v3228_v43, %v1401_v49  ;;  %v1293_v62 = vadd.f32 %v1285_v13, %v1268_v61  ;;  %v1261_v0 = vmul.f32 %v1401_v49, %v3182_v32 }
 0x165   : > { %v1244_v59 = vadd.f32 %v1236_v51, %v1211_v10  ;;  %v1335_v20 = vmul.f32 %v1401_v49, %v3207_v6  ;;  %v1437_v25 = vmax.f32 %v1429_v58, 0.0 }
 0x166   : > { %v1393_v53 = vadd.f32 %v1385_v57, %v1368_v56  ;;  %v1318_v22 = vadd.f32 %v1310_v19, %v1293_v62 }
 0x167   : > { %v1269_v23 = vadd.f32 %v1261_v0, %v1244_v59  ;;  %v1445_v11 = vmin.f32 %v1437_v25, 6.0 }
 0x168   : > { %v1418_v29 = vadd.f32 %v1410_v30, %v1393_v53  ;;  %v1343_v26 = vadd.f32 %v1335_v20, %v1318_v22 }
 0x169   : > { %v1277_v48 = vld [vmem:[#allocation2 + $0x80] sm:$0xff] }
 0x16a   : > { %v1302_v4 = vld [vmem:[#allocation2 + $0x81] sm:$0xff]  ;;  %v1430_v7 = vadd.f32 %v3243_v1, %v1418_v29  ;;  %v1286_v12 = vmul.f32 %v3193_v45, %v1277_v48  ;;  %v1361_v21 = vmul.f32 %v3213_v27, %v1277_v48  ;;  %v1412_v27 = vmul.f32 %v3228_v43, %v1403_v54  ;;  %v3343_v48 = vld [vmem:[%s3654_s8] ss:$0 sm:$0xff] }
 0x16b   : > { %v1327_v14 = vld [vmem:[#allocation2 + $0x82] sm:$0xff]  ;;  %v1311_v32 = vmul.f32 %v3197_v50, %v1302_v4  ;;  %v1386_v33 = vmul.f32 %v3219_v37, %v1302_v4 }
 0x16c   : > { %v1438_v8 = vmax.f32 %v1430_v7, 0.0  ;;  %v1294_v28 = vadd.f32 %v1286_v12, %v1269_v23  ;;  %v1369_v39 = vadd.f32 %v1361_v21, %v1343_v26  ;;  %v1336_v45 = vmul.f32 %v3207_v6, %v1327_v14  ;;  %v2586_v29 = vld [vmem:[%s3657_s11 + $0x8] sm:$0xff]  ;;  %v2585_v54 = vld [vmem:[%s3657_s11] sm:$0xff] }
 0x16d   : > { %v1411_v38 = vmul.f32 %v3228_v43, %v1327_v14  ;;  %1830 = vmatpush.bf16.msrb.mxu3 %v2586_v29 }
 0x16e   : > { %v1446_v35 = vmin.f32 %v1438_v8, 6.0  ;;  %v1319_v36 = vadd.f32 %v1311_v32, %v1294_v28  ;;  %v1394_v34 = vadd.f32 %v1386_v33, %v1369_v39 }
 0x170   : > { %v1451_v17 = vpack.c.bf16 %v1446_v35, %v1445_v11  ;;  %v1344_v3 = vadd.f32 %v1336_v45, %v1319_v36  ;;  %v1419_v47 = vadd.f32 %v1411_v38, %v1394_v34 }
 0x171   : > { %1831 = vmatpush.bf16.msrb.mxu3 %v2585_v54 }
 0x172   : > { %2460 = vmatmul.msk.bf16.gmra.mxu1 %vm1162_vm3, %v1451_v17  ;;  %v1370_v50 = vadd.f32 %v1362_v2, %v1344_v3  ;;  %v1431_v52 = vadd.f32 %v3243_v1, %v1419_v47 }
 0x174   : > { %v1395_v60 = vadd.f32 %v1387_v16, %v1370_v50  ;;  %v1439_v40 = vmax.f32 %v1431_v52, 0.0 }
 0x176   : > { %v1420_v31 = vadd.f32 %v1412_v27, %v1395_v60  ;;  %v1447_v42 = vmin.f32 %v1439_v40, 6.0 }
 0x178   : > { %v1432_v6 = vadd.f32 %v3243_v1, %v1420_v31 }
 0x17a   : > { %v1440_v55 = vmax.f32 %v1432_v6, 0.0 }
 0x17c   : > { %v1448_v41 = vmin.f32 %v1440_v55, 6.0 }
 0x17e   : > { %v1452_v18 = vpack.c.bf16 %v1448_v41, %v1447_v42 }
 0x182   : > { %2461 = vmatmul.msk.bf16.gmra.mxu1 %vm1162_vm3, %v1452_v18 }
 0x1cf   : > { %v1494_v37 = vpop.f32.mrf.mxu1 }
 0x1d0   : > { %v1495_v9 = vadd.f32 %v2650_v63, %v1494_v37  ;;  %v3372_v37 = vld [vmem:[%s3655_s9] sm:$0xff] }
 0x1d1   : > { %v1643_v29 = vperm.slane %v3372_v37, 2  ;;  %v1767_v54 = vperm.slane %v3372_v37, 7 }
 0x1d7   : > { %v1496_v43 = vpop.f32.mrf.mxu1 }
 0x1d8   : > { %v1497_v46 = vadd.f32 %v2650_v63, %v1496_v43 }
 0x1da   : > { %v1514_v49 = vpack.c.bf16 %v1497_v46, %v1495_v9 }
 0x1dc   : > { %2466 = vmatmul.msk.bf16.vlgmr.msra.gmra.mxu2 %vm1530_vm5, %v1514_v49 }
 0x1df   : > { %v1499_v1 = vpop.f32.mrf.mxu1 }
 0x1e0   : > { %v1500_v5 = vadd.f32 %v2650_v63, %v1499_v1 }
 0x1e7   : > { %v1501_v44 = vpop.f32.mrf.mxu1 }
 0x1e8   : > { %v1502_v10 = vadd.f32 %v2650_v63, %v1501_v44 }
 0x1ea   : > { %v1515_v51 = vpack.c.bf16 %v1502_v10, %v1500_v5 }
 0x1ec   : > { %2467 = vmatmul.msk.bf16.gmra.mxu2 %vm1530_vm5, %v1515_v51 }
 0x1ef   : > { %v1504_v56 = vpop.f32.mrf.mxu1 }
 0x1f0   : > { %v1505_v61 = vadd.f32 %v2650_v63, %v1504_v56 }
 0x1f7   : > { %v1506_v57 = vpop.f32.mrf.mxu1 }
 0x1f8   : > { %v1507_v13 = vadd.f32 %v2650_v63, %v1506_v57  ;;  %v1606_v57 = vperm.slane %v3372_v37, 0 }
 0x1fa   : > { %v1516_v30 = vpack.c.bf16 %v1507_v13, %v1505_v61 }
 0x1fc   : > { %2468 = vmatmul.msk.bf16.gmra.mxu2 %vm1530_vm5, %v1516_v30 }
 0x1ff   : > { %v1509_v58 = vpop.f32.mrf.mxu1 }
 0x200   : > { %v1510_v59 = vadd.f32 %v2650_v63, %v1509_v58  ;;  %v1629_v58 = vperm.slane %v3372_v37, 1 }
 0x207   : > { %v1511_v53 = vpop.f32.mrf.mxu1 }
 0x208   : > { %v1512_v62 = vadd.f32 %v2650_v63, %v1511_v53 }
 0x20a   : > { %v1517_v19 = vpack.c.bf16 %v1512_v62, %v1510_v59 }
 0x20c   : > { %2469 = vmatmul.msk.bf16.gmra.mxu2 %vm1530_vm5, %v1517_v19 }
 0x25f   : > { %v1552_v0 = vpop.f32.mrf.mxu2 }
 0x260   : > { %v1553_v4 = vadd.f32 %v3343_v48, %v1552_v0 }
 0x262   : > { %v1572_v25 = vmax.f32 %v1553_v4, 0.0 }
 0x264   : > { %v1580_v24 = vmin.f32 %v1572_v25, 6.0 }
 0x266   : > { %v1649_v28 = vrot.slane %v1580_v24, 1  ;;  %v1673_v2 = vrot.slane %v1580_v24, 2  ;;  %v1651_v33 = vrot.slane %v1580_v24, 3  ;;  %v1675_v36 = vrot.slane %v1580_v24, 4 }
 0x267   : > { %v1554_v22 = vpop.f32.mrf.mxu2  ;;  %v1701_v3 = vrot.slane %v1580_v24, 5 }
 0x268   : > { %v1555_v20 = vadd.f32 %v3343_v48, %v1554_v22  ;;  %v1661_v35 = vsel %vm588_vm0, 0.0, %v1649_v28  ;;  %v1689_v17 = vsel %vm588_vm0, %v1580_v24, %v1673_v2  ;;  %v1707_v27 = vsel %vm588_vm0, %v1649_v28, %v1651_v33 }
 0x269   : > { %v1662_v31 = vsel %vm589_vm1, %v1661_v35, %v1651_v33  ;;  %v1690_v55 = vsel %vm589_vm1, %v1689_v17, %v1675_v36  ;;  %v1708_v63 = vsel %vm589_vm1, %v1707_v27, %v1701_v3  ;;  %v1714_v2 = vperm.slane %v3372_v37, 5 }
 0x26a   : > { %v1573_v23 = vmax.f32 %v1555_v20, 0.0  ;;  %v1663_v49 = vsel %vm1623_vm6, %v1662_v31, 0.0  ;;  %v1668_v20 = vperm.slane %v3372_v37, 3 }
 0x26c   : > { %v1581_v14 = vmin.f32 %v1573_v23, 6.0 }
 0x26e   : > { %v1720_v39 = vrot.slane %v1581_v14, 1  ;;  %v1744_v11 = vrot.slane %v1581_v14, 2  ;;  %v1722_v45 = vrot.slane %v1581_v14, 3  ;;  %v1746_v47 = vrot.slane %v1581_v14, 4 }
 0x26f   : > { %v1557_v7 = vpop.f32.mrf.mxu2  ;;  %v1772_v6 = vrot.slane %v1581_v14, 5 }
 0x270   : > { %v1558_v12 = vadd.f32 %v3343_v48, %v1557_v7  ;;  %v1732_v16 = vsel %vm588_vm0, 0.0, %v1720_v39  ;;  %v1760_v52 = vsel %vm588_vm0, %v1581_v14, %v1744_v11  ;;  %v1778_v42 = vsel %vm588_vm0, %v1720_v39, %v1722_v45 }
 0x271   : > { %v1733_v41 = vsel %vm589_vm1, %v1732_v16, %v1722_v45  ;;  %v3380_v1 = vsel %vm589_vm1, %v1760_v52, %v1746_v47  ;;  %v1779_v51 = vsel %vm589_vm1, %v1778_v42, %v1772_v6  ;;  %v1739_v11 = vperm.slane %v3372_v37, 6 }
 0x272   : > { %v1574_v26 = vmax.f32 %v1558_v12, 0.0  ;;  %v1734_v10 = vsel %vm1623_vm6, %v1733_v41, 0.0 }
 0x274   : > { %v3349_v15 = vmin.f32 %v1574_v26, 6.0 }
 0x276   : > { %v1591_v38 = vrot.slane %v3349_v15, 6  ;;  %v1611_v60 = vrot.slane %v3349_v15, 5  ;;  %v1613_v9 = vrot.slane %v3349_v15, 7  ;;  %v1615_v0 = vrot.slane %v3349_v15, 1 }
 0x277   : > { %v1559_v21 = vpop.f32.mrf.mxu2  ;;  %v1634_v22 = vrot.slane %v3349_v15, 2 }
 0x278   : > { %v1560_v8 = vadd.f32 %v3343_v48, %v1559_v21  ;;  %v1599_v43 = vsel %vm1598_vm7, 0.0, %v1591_v38  ;;  %v1624_v44 = vsel %vm1623_vm6, 0.0, %v1611_v60  ;;  %v1638_v5 = vsel %vm1623_vm6, 0.0, %v1591_v38 }
 0x279   : > { %v1601_v61 = vsel %vm1600_vm8, %v1599_v43, %v3349_v15  ;;  %v1639_v53 = vsel %vm1598_vm7, %v1638_v5, %v3349_v15  ;;  %v1625_v19 = vsel %vm1598_vm7, %v1624_v44, %v1613_v9 }
 0x27a   : > { %v1575_v32 = vmax.f32 %v1560_v8, 0.0  ;;  %v1603_v12 = vsel %vm1602_vm9, %v1601_v61, 0.0  ;;  %v1626_v14 = vsel %vm1600_vm8, %v1625_v19, %v1615_v0  ;;  %v1640_v26 = vsel %vm1600_vm8, %v1639_v53, %v1634_v22  ;;  %v2518_v61 = vld [vmem:[%s3659_s13 + $0x44] sm:$0xf] }
 0x27b   : > { %v2042_v19 = vunpack.c.l.b16 %v2518_v61 }
 0x27c   : > { %v3352_v34 = vmin.f32 %v1575_v32, 6.0  ;;  %v1696_v32 = vperm.slane %v3372_v37, 4 }
 0x27e   : > { %v1654_v18 = vrot.slane %v3352_v34, 6  ;;  %v1677_v46 = vrot.slane %v3352_v34, 5  ;;  %v1679_v30 = vrot.slane %v3352_v34, 7  ;;  %v1681_v8 = vrot.slane %v3352_v34, 1 }
 0x27f   : > { %v1562_v50 = vpop.f32.mrf.mxu2  ;;  %v1703_v28 = vrot.slane %v3352_v34, 2 }
 0x280   : > { %v1563_v40 = vadd.f32 %v3343_v48, %v1562_v50  ;;  %v1664_v13 = vsel %vm1598_vm7, %v1663_v49, %v1654_v18  ;;  %v1691_v59 = vsel %vm1623_vm6, %v1690_v55, %v1677_v46  ;;  %v1709_v25 = vsel %vm1623_vm6, %v1708_v63, %v1654_v18 }
 0x281   : > { %v1665_v7 = vsel %vm1600_vm8, %v1664_v13, %v3352_v34  ;;  %v1692_v21 = vsel %vm1598_vm7, %v1691_v59, %v1679_v30  ;;  %v1710_v39 = vsel %vm1598_vm7, %v1709_v25, %v3352_v34 }
 0x282   : > { %v1576_v56 = vmax.f32 %v1563_v40, 0.0  ;;  %v1666_v33 = vsel %vm1602_vm9, %v1665_v7, 0.0  ;;  %v1693_v45 = vsel %vm1600_vm8, %v1692_v21, %v1681_v8 }
 0x284   : > { %v3404_v23 = vmin.f32 %v1576_v56, 6.0  ;;  %v1711_v56 = vsel %vm1600_vm8, %v1710_v39, %v1703_v28 }
 0x286   : > { %v1725_v35 = vrot.slane %v3404_v23, 6  ;;  %v1748_v36 = vrot.slane %v3404_v23, 5  ;;  %v1750_v50 = vrot.slane %v3404_v23, 7  ;;  %v1752_v34 = vrot.slane %v3404_v23, 1 }
 0x287   : > { %v1564_v62 = vpop.f32.mrf.mxu2  ;;  %v1774_v27 = vrot.slane %v3404_v23, 2 }
 0x288   : > { %v1565_v4 = vadd.f32 %v3343_v48, %v1564_v62  ;;  %v1735_v63 = vsel %vm1598_vm7, %v1734_v10, %v1725_v35  ;;  %v1762_v49 = vsel %vm1623_vm6, %v3380_v1, %v1748_v36  ;;  %v1780_v44 = vsel %vm1623_vm6, %v1779_v51, %v1725_v35  ;;  %v2510_v10 = vld [vmem:[%s3659_s13 + $0x38] sm:$0xf]  ;;  %v2481_v51 = vld [vmem:[%s3659_s13 + $0x14] sm:$0xf] }
 0x289   : > { %v1736_v53 = vsel %vm1600_vm8, %v1735_v63, %v3404_v23  ;;  %v1781_v0 = vsel %vm1598_vm7, %v1780_v44, %v3404_v23  ;;  %v1860_v7 = vunpack.c.l.b16 %v2481_v51  ;;  %v2044_v36 = vpack.c.b16 %v2042_v19, %v2042_v19 }
 0x28a   : > { %v1577_v24 = vmax.f32 %v1565_v4, 0.0 }
 0x28c   : > { %v1585_v15 = vmin.f32 %v1577_v24, 6.0 }
 0x28e   : > { %v1594_v17 = vrot.slane %v1585_v15, 3  ;;  %v1596_v3 = vrot.slane %v1585_v15, 5  ;;  %v1617_v16 = vrot.slane %v1585_v15, 2  ;;  %v1619_v38 = vrot.slane %v1585_v15, 4 }
 0x28f   : > { %v1621_v47 = vrot.slane %v1585_v15, 6  ;;  %v1567_v60 = vpop.f32.mrf.mxu2  ;;  %v1636_v18 = vrot.slane %v1585_v15, 7 }
 0x290   : > { %v1605_v31 = vsel %vm1604_vm10, %v1603_v12, %v1594_v17  ;;  %v1608_v52 = vmul.f32 %v1606_v57, %v1596_v3  ;;  %v1627_v6 = vsel %vm1602_vm9, %v1626_v14, %v1617_v16  ;;  %v1641_v40 = vsel %vm1602_vm9, %v1640_v26, %v1594_v17 }
 0x291   : > { %v1607_v55 = vmul.f32 %v1606_v57, %v1605_v31  ;;  %v1628_v41 = vsel %vm1604_vm10, %v1627_v6, %v1619_v38  ;;  %v1631_v42 = vmul.f32 %v1629_v58, %v1621_v47  ;;  %v1642_v9 = vsel %vm1604_vm10, %v1641_v40, %v1596_v3  ;;  %v2502_v57 = vld [vmem:[%s3659_s13 + $0x2c] sm:$0xf] }
 0x292   : > { %v1630_v43 = vmul.f32 %v1629_v58, %v1628_v41  ;;  %v1568_v46 = vadd.f32 %v3343_v48, %v1567_v60  ;;  %v1963_v1 = vunpack.c.l.b16 %v2502_v57  ;;  %v2003_v58 = vunpack.c.l.b16 %v2510_v10 }
 0x293   : > { %v1633_v5 = vadd.f32 %v1631_v42, %v1608_v52  ;;  %v1644_v59 = vmul.f32 %v1643_v29, %v1642_v9  ;;  %v1645_v62 = vmul.f32 %v1643_v29, %v1636_v18  ;;  %v1763_v14 = vsel %vm1598_vm7, %v1762_v49, %v1750_v50 }
 0x294   : > { %v1632_v13 = vadd.f32 %v1630_v43, %v1607_v55  ;;  %v1578_v30 = vmax.f32 %v1568_v46, 0.0  ;;  %v1965_v4 = vpack.c.b16 %v1963_v1, %v1963_v1  ;;  %v2005_v26 = vpack.c.b16 %v2003_v58, %v2003_v58  ;;  %v2652_v1 = vld [vmem:[%s3655_s9 + $0x8] ss:$0 sm:$0xff] }
 0x295   : > { %v1647_v12 = vadd.f32 %v1645_v62, %v1633_v5  ;;  %v1862_v38 = vpack.c.b16 %v1860_v7, %v1860_v7  ;;  %v2050_v55 = vsel %vm1598_vm7, %v2044_v36, 0  ;;  %v1737_v9 = vsel %vm1602_vm9, %v1736_v53, 0.0  ;;  %v2653_v7 = vld [vmem:[%s3656_s10] ss:$0 sm:$0xff]  ;;  %v2534_v36 = vld [vmem:[%s3659_s13 + $0x5c] sm:$0xf] }
 0x296   : > { %v1586_v22 = vmin.f32 %v1578_v30, 6.0  ;;  %v1646_v25 = vadd.f32 %v1644_v59, %v1632_v13  ;;  %v1971_v35 = vsel %vm1598_vm7, %v1965_v4, 0  ;;  %2058 = vmatpush.bf16.msrb.mxu2 %v2050_v55  ;;  %v2654_v55 = vld [vmem:[%s3658_s12] ss:$0 sm:$0xff] }
 0x297   : > { %v1569_v24 = vpop.f32.mrf.mxu2  ;;  %1979 = vmatpush.bf16.msrb.mxu0 %v1971_v35  ;;  %v1869_v63 = vsel %vm1598_vm7, %v1862_v38, 0  ;;  %v2591_v35 = vld [vmem:[%s3659_s13 + $0x30] sm:$0xff] }
 0x298   : > { %v1657_v21 = vrot.slane %v1586_v22, 3  ;;  %v1659_v8 = vrot.slane %v1586_v22, 5  ;;  %v1683_v28 = vrot.slane %v1586_v22, 2  ;;  %v1685_v39 = vrot.slane %v1586_v22, 4  ;;  %1877 = vmatpush.bf16.msra.mxu3 %v1869_v63 }
 0x299   : > { %v1687_v15 = vrot.slane %v1586_v22, 6  ;;  %v1570_v29 = vadd.f32 %v3343_v48, %v1569_v24  ;;  %v1705_v60 = vrot.slane %v1586_v22, 7 }
 0x29a   : > { %v1667_v17 = vsel %vm1604_vm10, %v1666_v33, %v1657_v21  ;;  %v1670_v3 = vmul.f32 %v1668_v20, %v1659_v8  ;;  %v1694_v16 = vsel %vm1602_vm9, %v1693_v45, %v1683_v28  ;;  %v1712_v48 = vsel %vm1602_vm9, %v1711_v56, %v1657_v21 }
 0x29b   : > { %v1669_v50 = vmul.f32 %v1668_v20, %v1667_v17  ;;  %v1695_v47 = vsel %vm1604_vm10, %v1694_v16, %v1685_v39  ;;  %v1698_v33 = vmul.f32 %v1696_v32, %v1687_v15  ;;  %v1579_v6 = vmax.f32 %v1570_v29, 0.0  ;;  %v2588_v39 = vld [vmem:[%s3659_s13 + $0xc] sm:$0xff]  ;;  %v2590_v15 = vld [vmem:[%s3659_s13 + $0x24] sm:$0xff]  ;;  %v2592_v29 = vld [vmem:[%s3659_s13 + $0x3c] sm:$0xff] }
 0x29c   : > { %v1672_v31 = vadd.f32 %v1670_v3, %v1647_v12  ;;  %v1697_v52 = vmul.f32 %v1696_v32, %v1695_v47  ;;  %v1764_v45 = vsel %vm1600_vm8, %v1763_v14, %v1752_v34  ;;  %v2011_v20 = vsel %vm1598_vm7, %v2005_v26, 0  ;;  %1878 = vmatpush.bf16.msra.mxu3 %v2588_v39  ;;  %1980 = vmatpush.bf16.msrb.mxu0 %v2590_v15  ;;  %v1845_v17 = vld [vmem:[%s3659_s13 + $0x8] sm:$0xf] }
 0x29d   : > { %v1671_v40 = vadd.f32 %v1669_v50, %v1646_v25  ;;  %v1713_v42 = vsel %vm1604_vm10, %v1712_v48, %v1659_v8  ;;  %v1587_v18 = vmin.f32 %v1579_v6, 6.0  ;;  %2019 = vmatpush.bf16.msrb.mxu1 %v2011_v20  ;;  %v1716_v32 = vmul.f32 %v1714_v2, %v1705_v60  ;;  %2059 = vmatpush.bf16.msrb.mxu2 %v2592_v29  ;;  %v2594_v48 = vld [vmem:[%s3659_s13 + $0x54] sm:$0xff]  ;;  %v2595_v20 = vld [vmem:[%s3659_s13 + $0x60] sm:$0xff] }
 0x29e   : > { %v1700_v41 = vadd.f32 %v1698_v33, %v1672_v31  ;;  %v1782_v34 = vsel %vm1600_vm8, %v1781_v0, %v1774_v27  ;;  %v1715_v10 = vmul.f32 %v1714_v2, %v1713_v42  ;;  %v2118_v3 = vunpack.c.l.b16 %v2534_v36  ;;  %v2587_v31 = vld [vmem:[%s3659_s13] sm:$0xff] }
 0x29f   : > { %v1699_v43 = vadd.f32 %v1697_v52, %v1671_v40  ;;  %v1728_v46 = vrot.slane %v1587_v18, 3  ;;  %v1730_v49 = vrot.slane %v1587_v18, 5  ;;  %v1754_v44 = vrot.slane %v1587_v18, 2  ;;  %v2542_v52 = vld [vmem:[%s3659_s13 + $0x68] sm:$0xf] }
 0x2a0   : > { %v1756_v5 = vrot.slane %v1587_v18, 4  ;;  %v1758_v56 = vrot.slane %v1587_v18, 6  ;;  %v1776_v57 = vrot.slane %v1587_v18, 7  ;;  %v1718_v61 = vadd.f32 %v1716_v32, %v1700_v41  ;;  %v2494_v40 = vld [vmem:[%s3659_s13 + $0x20] sm:$0xf] }
 0x2a1   : > { %v1741_v13 = vmul.f32 %v1739_v11, %v1730_v49  ;;  %v1765_v30 = vsel %vm1602_vm9, %v1764_v45, %v1754_v44  ;;  %v1738_v23 = vsel %vm1604_vm10, %v1737_v9, %v1728_v46  ;;  %v1783_v27 = vsel %vm1602_vm9, %v1782_v34, %v1728_v46  ;;  %2020 = vmatpush.bf16.msrb.mxu1 %v2591_v35 }
 0x2a2   : > { %v1717_v58 = vadd.f32 %v1715_v10, %v1699_v43  ;;  %v1740_v51 = vmul.f32 %v1739_v11, %v1738_v23  ;;  %v1766_v2 = vsel %vm1604_vm10, %v1765_v30, %v1756_v5  ;;  %v1769_v62 = vmul.f32 %v1767_v54, %v1758_v56 }
 0x2a3   : > { %v1743_v53 = vadd.f32 %v1741_v13, %v1718_v61  ;;  %v1768_v59 = vmul.f32 %v1767_v54, %v1766_v2  ;;  %v1784_v19 = vsel %vm1604_vm10, %v1783_v27, %v1730_v49  ;;  %v1787_v4 = vmul.f32 %v2652_v1, %v1776_v57 }
 0x2a4   : > { %v1742_v0 = vadd.f32 %v1740_v51, %v1717_v58  ;;  %v1786_v11 = vmul.f32 %v2652_v1, %v1784_v19  ;;  %v1889_v16 = vunpack.c.l.b16 %v1845_v17  ;;  %v2120_v38 = vpack.c.b16 %v2118_v3, %v2118_v3  ;;  %v2526_v19 = vld [vmem:[%s3659_s13 + $0x50] sm:$0xf] }
 0x2a5   : > { %v1771_v22 = vadd.f32 %v1769_v62, %v1743_v53  ;;  %v2155_v33 = vunpack.c.l.b16 %v2542_v52  ;;  %v1924_v41 = vunpack.c.l.b16 %v2494_v40  ;;  %v2589_v53 = vld [vmem:[%s3659_s13 + $0x18] sm:$0xff]  ;;  %v2602_v40 = vld [vmem:[%s3661_s15 + $0x30] sm:$0xff] }
 0x2a6   : > { %v1770_v25 = vadd.f32 %v1768_v59, %v1742_v0  ;;  %v1891_v50 = vpack.c.b16 %v1889_v16, %v1889_v16  ;;  %v2126_v47 = vsel %vm1598_vm7, %v2120_v38, 0  ;;  %v2603_v52 = vld [vmem:[%s3661_s15 + $0x38] sm:$0xff] }
 0x2a7   : > { %v1789_v12 = vadd.f32 %v1787_v4, %v1771_v22  ;;  %2134 = vmatpush.bf16.msra.mxu0 %v2126_v47  ;;  %v2157_v6 = vpack.c.b16 %v2155_v33, %v2155_v33  ;;  %v1926_v63 = vpack.c.b16 %v1924_v41, %v1924_v41  ;;  %2263 = vmatpush.bf16.msra.mxu2 %v2603_v52 }
 0x2a8   : > { %v1788_v24 = vadd.f32 %v1786_v11, %v1770_v25  ;;  %v1897_v60 = vsel %vm1598_vm7, %v1891_v50, 0 }
 0x2a9   : > { %v1795_v14 = vadd.f32 %v2653_v7, %v1789_v12  ;;  %v2163_v45 = vsel %vm1598_vm7, %v2157_v6, 0  ;;  %v1932_v23 = vsel %vm1598_vm7, %v1926_v63, 0 }
 0x2aa   : > { %v1794_v26 = vadd.f32 %v2653_v7, %v1788_v24  ;;  %2171 = vmatpush.bf16.msra.mxu1 %v2163_v45  ;;  %v2081_v7 = vunpack.c.l.b16 %v2526_v19 }
 0x2ab   : > { %v1797_v21 = vmax.f32 %v1795_v14, 0.0  ;;  %2135 = vmatpush.bf16.msra.mxu0 %v2594_v48  ;;  %2264 = vmatpush.bf16.msra.mxu2 %v2602_v40 }
 0x2ac   : > { %v1796_v8 = vmax.f32 %v1794_v26, 0.0  ;;  %v2083_v12 = vpack.c.b16 %v2081_v7, %v2081_v7 }
 0x2ad   : > { %v1799_v28 = vmin.f32 %v1797_v21, 6.0 }
 0x2ae   : > { %v1798_v37 = vmin.f32 %v1796_v8, 6.0  ;;  %2172 = vmatpush.bf16.msra.mxu1 %v2595_v20  ;;  %v2089_v8 = vsel %vm1598_vm7, %v2083_v12, 0 }
 0x2b0   : > { %v1800_v54 = vpack.c.bf16 %v1799_v28, %v1798_v37  ;;  %v2593_v37 = vld [vmem:[%s3659_s13 + $0x48] sm:$0xff] }
 0x2b2   : > { %2478 = vmatmul.msk.bf16.vlgmr.msrb.gmra.mxu3 %vm1162_vm3, %v1800_v54 }
 0x2b3   : > { %1905 = vmatpush.bf16.msrb.mxu3 %v1897_v60 }
 0x2b7   : > { %1906 = vmatpush.bf16.msrb.mxu3 %v2587_v31 }
 0x335   : > { %v1833_v42 = vpop.f32.mrf.mxu3 }
 0x336   : > { %v1834_v18 = vadd.f32 %v2654_v55, %v1833_v42  ;;  %v2601_v42 = vld [vmem:[%s3661_s15 + $0x28] sm:$0xff] }
 0x337   : > { %2265 = vmatpush.bf16.msra.mxu2 %v2601_v42 }
 0x338   : > { %v1839_v32 = vrot.slane %v1834_v18, 1  ;;  %v1948_v43 = vrot.slane %v1834_v18, 4  ;;  %v1950_v9 = vsel %vm588_vm0, 0.0, %v1834_v18  ;;  %v1846_v34 = vrot.slane %v1834_v18, 2 }
 0x339   : > { %v1951_v46 = vsel %vm589_vm1, %v1950_v9, 0.0  ;;  %v2027_v49 = vrot.slane %v1834_v18, 5  ;;  %v2066_v2 = vrot.slane %v1834_v18, 3 }
 0x33a   : > { %v1952_v44 = vsel %vm1623_vm6, %v1951_v46, %v1948_v43  ;;  %v1848_v5 = vsel %vm589_vm1, 0.0, %v1839_v32  ;;  %v2029_v56 = vsel %vm588_vm0, %v1839_v32, 0.0  ;;  %v1990_v51 = vsel %vm588_vm0, %v1834_v18, %v1839_v32 }
 0x33b   : > { %v1953_v57 = vpack.c.bf16 %v1952_v44, %v1952_v44  ;;  %v1849_v10 = vsel %vm1623_vm6, %v1848_v5, %v1846_v34  ;;  %v2030_v61 = vsel %vm589_vm1, %v2029_v56, %v2027_v49  ;;  %v1991_v62 = vsel %vm589_vm1, %v1990_v51, %v1948_v43  ;;  %v2597_v44 = vld [vmem:[%s3661_s15 + $0x8] sm:$0xff] }
 0x33c   : > { %v1850_v13 = vpack.c.bf16 %v1849_v10, %v1849_v10  ;;  %v2031_v30 = vsel %vm1623_vm6, %v2030_v61, 0.0  ;;  %v2105_v22 = vsel %vm588_vm0, %v2066_v2, %v1948_v43  ;;  %v1841_v24 = vsel %vm1623_vm6, 0.0, %v1839_v32  ;;  %v2600_v32 = vld [vmem:[%s3661_s15 + $0x20] sm:$0xff] }
 0x33d   : > { %v1835_v27 = vpop.f32.mrf.mxu3  ;;  %2507 = vmatmul.msk.bf16.vlgmr.msrb.gmra.mxu0 %vm1864_vm11, %v1953_v57  ;;  %v2032_v1 = vpack.c.bf16 %v2031_v30, %v2031_v30  ;;  %v2106_v25 = vsel %vm589_vm1, %v2105_v22, 0.0  ;;  %v2142_v14 = vsel %vm588_vm0, %v1948_v43, 0.0  ;;  %v1842_v21 = vpack.c.bf16 %v1841_v24, %v1841_v24  ;;  %2266 = vmatpush.bf16.msra.mxu2 %v2600_v32  ;;  %v2599_v43 = vld [vmem:[%s3661_s15 + $0x18] sm:$0xff]  ;;  %v2596_v57 = vld [vmem:[%s3661_s15] sm:$0xff] }
 0x33e   : > { %v1836_v58 = vadd.f32 %v2654_v55, %v1835_v27  ;;  %2486 = vmatmul.msk.bf16.vlgmr.msra.gmra.mxu3 %vm1864_vm11, %v1850_v13  ;;  %v2107_v11 = vsel %vm1623_vm6, %v2106_v25, 0.0  ;;  %v2143_v28 = vsel %vm589_vm1, %v2142_v14, 0.0  ;;  %v1912_v15 = vsel %vm589_vm1, 0.0, %v1846_v34  ;;  %v2598_v34 = vld [vmem:[%s3661_s15 + $0x10] sm:$0xff]  ;;  %v2655_v27 = vld [vmem:[%s3660_s14] ss:$0 sm:$0xff] }
 0x33f   : > { %2523 = vmatmul.msk.bf16.vlgmr.msrb.gmra.mxu2 %vm1864_vm11, %v2032_v1  ;;  %1940 = vmatpush.bf16.msra.mxu3 %v1932_v23  ;;  %v2108_v26 = vpack.c.bf16 %v2107_v11, %v2107_v11  ;;  %v2144_v54 = vsel %vm1623_vm6, %v2143_v28, 0.0  ;;  %v1913_v29 = vsel %vm1623_vm6, %v1912_v15, 0.0  ;;  %v2068_v36 = vsel %vm588_vm0, 0.0, %v2066_v2  ;;  %v2214_v11 = vld [vmem:[%s3662_s16] sm:$0x1] }
 0x340   : > { %v1988_v59 = vrot.slane %v1836_v58, 5  ;;  %v2145_v39 = vpack.c.bf16 %v2144_v54, %v2144_v54  ;;  %v1914_v35 = vpack.c.bf16 %v1913_v29, %v1913_v29  ;;  %v2069_v17 = vsel %vm589_vm1, %v2068_v36, 0.0 }
 0x341   : > { %v2070_v3 = vsel %vm1623_vm6, %v2069_v17, 0.0  ;;  %2267 = vmatpush.bf16.msra.mxu2 %v2599_v43 }
 0x342   : > { %v1992_v0 = vsel %vm1623_vm6, %v1991_v62, %v1988_v59  ;;  %v2071_v16 = vpack.c.bf16 %v2070_v3, %v2070_v3 }
 0x343   : > { %v1993_v4 = vpack.c.bf16 %v1992_v0, %v1992_v0  ;;  %1941 = vmatpush.bf16.msra.mxu3 %v2589_v53 }
 0x345   : > { %2515 = vmatmul.msk.bf16.vlgmr.msrb.gmra.mxu1 %vm1864_vm11, %v1993_v4  ;;  %2268 = vmatpush.bf16.msra.mxu2 %v2598_v34 }
 0x349   : > { %2269 = vmatpush.bf16.msra.mxu2 %v2597_v44 }
 0x34d   : > { %2539 = vmatmul.msk.bf16.vlgmr.msra.gmra.mxu0 %vm1864_vm11, %v2108_v26  ;;  %2270 = vmatpush.bf16.msra.mxu2 %v2596_v57 }
 0x34e   : > { %2491 = vmatmul.msk.bf16.vlgmr.msrb.gmra.mxu3 %vm1864_vm11, %v1842_v21 }
 0x34f   : > { %2097 = vmatpush.bf16.msrb.mxu3 %v2089_v8 }
 0x353   : > { %2098 = vmatpush.bf16.msrb.mxu3 %v2593_v37 }
 0x355   : > { %2547 = vmatmul.msk.bf16.vlgmr.msra.gmra.mxu1 %vm1864_vm11, %v2145_v39 }
 0x35e   : > { %2499 = vmatmul.msk.bf16.vlgmr.msra.gmra.mxu3 %vm1864_vm11, %v1914_v35 }
 0x36e   : > { %2531 = vmatmul.msk.bf16.vlgmr.msrb.gmra.mxu3 %vm1864_vm11, %v2071_v16 }
 0x3ba   : > { %v1982_v38 = vpop.f32.mrf.mxu0 }
 0x3c1   : > { %v1880_v50 = vpop.f32.mrf.mxu3 }
 0x3c2   : > { %v1984_v47 = vpop.f32.mrf.mxu0  ;;  %v2022_v60 = vpop.f32.mrf.mxu1 }
 0x3c3   : > { %v2061_v48 = vpop.f32.mrf.mxu2 }
 0x3c9   : > { %v1882_v31 = vpop.f32.mrf.mxu3 }
 0x3ca   : > { %v2024_v33 = vpop.f32.mrf.mxu1  ;;  %v2137_v6 = vpop.f32.mrf.mxu0 }
 0x3cb   : > { %v2063_v45 = vpop.f32.mrf.mxu2 }
 0x3d1   : > { %v1908_v20 = vpop.f32.mrf.mxu3 }
 0x3d2   : > { %v2139_v55 = vpop.f32.mrf.mxu0  ;;  %v2174_v41 = vpop.f32.mrf.mxu1  ;;  %v1909_v46 = vadd.f32 %v1908_v20, %v1880_v50 }
 0x3d9   : > { %v1910_v18 = vpop.f32.mrf.mxu3 }
 0x3da   : > { %v2176_v63 = vpop.f32.mrf.mxu1 }
 0x3e1   : > { %v1943_v9 = vpop.f32.mrf.mxu3 }
 0x3e2   : > { %v1947_v49 = vadd.f32 %v1943_v9, %v1909_v46 }
 0x3e4   : > { %v1986_v5 = vadd.f32 %v1982_v38, %v1947_v49 }
 0x3e6   : > { %v2026_v10 = vadd.f32 %v2022_v60, %v1986_v5 }
 0x3e8   : > { %v2065_v61 = vadd.f32 %v2061_v48, %v2026_v10 }
 0x3e9   : > { %v1945_v56 = vpop.f32.mrf.mxu3 }
 0x3f1   : > { %v2100_v13 = vpop.f32.mrf.mxu3 }
 0x3f2   : > { %v2104_v30 = vadd.f32 %v2100_v13, %v2065_v61 }
 0x3f4   : > { %v2141_v23 = vadd.f32 %v2137_v6, %v2104_v30 }
 0x3f6   : > { %v2178_v1 = vadd.f32 %v2174_v41, %v2141_v23 }
 0x3f8   : > { %v2183_v58 = vadd.f32 %v2655_v27, %v2178_v1 }
 0x3f9   : > { %v2102_v51 = vpop.f32.mrf.mxu3 }
 0x3fa   : > { %v2184_v2 = vmax.f32 %v2183_v58, 0.0 }
 0x3fc   : > { %v2185_v53 = vmin.f32 %v2184_v2, 6.0 }
 0x3fe   : > { %v2187_v59 = vrot.slane %v2185_v53, 1  ;;  %v2190_v19 = vrot.slane %v2185_v53, 2  ;;  %v2193_v22 = vrot.slane %v2185_v53, 3 }
 0x400   : > { %v2189_v62 = vadd.f32 %v2187_v59, %v2185_v53 }
 0x402   : > { %v2192_v0 = vadd.f32 %v2190_v19, %v2189_v62 }
 0x404   : > { %v2195_v4 = vadd.f32 %v2193_v22, %v2192_v0 }
 0x406   : > { %v2196_v7 = vmul.f32 0.25, %v2195_v4 }
 0x408   : > { %v2197_v25 = vpack.c.bf16 %v2196_v7, %v2196_v7 }
 0x40a   : > { %2271 = vmatmul.bf16.vlgmr.msra.gmra.mxu2 %v2197_v25 }
 0x48d   : > { %v2272_v12 = vpop.f32.mrf.mxu2 }
 0x48e   : > { %v2273_v24 = vadd.f32 %v2272_v12, %v2214_v11 }
 0x490   : > { %2276 = vst [vmem:[%s540_s2] sm:$0x1] %v2273_v24 }
 0x491   : > { %2683 = shalt.err (!%p2680_p3)
}
 0x492   : > { %2606 = dma.vmem_to_hbm [thread:$0]  (%p2850_p5), %s2289_s22, 16, %s2291_s19, %s2278_s26  }
 0x495   : > { %v2274_v14 = vpop.f32.mrf.mxu2 }
 0x496 PF: > { %p2612_p4 = scmp.ge.s32.totalorder %s2718_s27, 2  ;;  %s2302_s20 = sand.u32 1, %s2706_s24  }
 0x497   : > { %s2303_s2 = scalar_lea.sflag [#allocation4], %s2302_s20 }
 0x498   : > { %p2609_p7 = pnand %p2612_p4, %p2854_p6 }
 0x49a   : > { %p2610_p8 = pneg %p2609_p7 }
 0x49c   : > { %2701 = dma.done.wait (%p2610_p8), %s2303_s2, 16  }
 0x49d   : > { %2703 = vsyncadd (%p2610_p8), %s2303_s2, 4294967280  ;;  %s3686_s27 = sld [smem:[#allocation7_spill]]  ;;  %s3689_s24 = smov %s2710_s25 }
 0x49e   : > { %s3687_s3 = sld [smem:[#allocation6_spill]] }
 0x49f   : > { %s3688_s26 = sld [smem:[#allocation8_spill]] }
 0x4a3   : > { %p27_p9 = scmp.ge.s32.totalorder %s3686_s27, 4  }
 0x4a4   : > { %s3690_s25 = smov %s3687_s3 }
 0x4a5   :  { %29 = sbr.rel (!%p27_p9) target bundleno = 9 (0x9), region = 146 }
 0x4aa   :  { %2308 = vsyncpa [#allocation4], 1 }
 0x4ab   :  { %2310 = vsyncpa [#allocation4 + $0x1], 1 }

</bundles_post_ra>
